<compile_context>
chip_gen: v5e
topology: v5e:2x2
jax: 0.10.0
libtpu: 0.0.40
codegen_flags: <defaults>
</compile_context>

<pallas_src>
import jax
import jax.numpy as jnp
from jax.experimental import pallas as pl
from jax.experimental.pallas import tpu as pltpu


_H = 256  # hidden width of each dueling stream


def _round_up(n, m):
    return ((n + m - 1) // m) * m


def dueling_dqn_kernel(
    xT_ref,                    # (4, tile_b)            f32, batch in lanes
    w1_ref, b1_ref,            # conv1: (64, 4), (64, 1)        -- VPU layer
    w2_ref, b2_ref,            # conv2: (64, 64), (64, 1)
    wva_ref, bva_ref,          # fc_value [|| fc_adv]: (256|512, 64), (256|512, 1)
    wh_ref, bh_ref,            # head column(s): (256|512, 1), (1|2, 1)
    q_ref,                     # (1, tile_b)            f32, lane-dense out
):
    mm = w2_ref.dtype          # MXU operand dtype (f32 or bf16); f32 accumulate

    # ---- Layer 1 (K=4): degenerate for the MXU -> 4 broadcast FMAs on VPU.
    x = xT_ref[...]                              # (4, tile_b) f32
    w1 = w1_ref[...]                             # (64, 4) f32
    h = b1_ref[...] + w1[:, 0:1] * x[0:1, :]     # (64, tile_b)
    for k in range(1, 4):
        h = h + w1[:, k : k + 1] * x[k : k + 1, :]
    h = jnp.maximum(h, 0.0)

    # ---- Layer 2: 64x64 on the MXU; the batch fills the N lanes.
    h = jnp.dot(w2_ref[...], h.astype(mm),
                preferred_element_type=jnp.float32) + b2_ref[...]
    h = jnp.maximum(h, 0.0)                      # (64, tile_b)

    # ---- Dueling hidden layer: value stream (plus adv stream iff faithful).
    va = jnp.dot(wva_ref[...], h.astype(mm),
                 preferred_element_type=jnp.float32) + bva_ref[...]
    va = jnp.maximum(va, 0.0)                    # (256 or 512, tile_b)

    # ---- Heads off the MXU: VPU multiply + cross-sublane (XLU) reduce.
    wh = wh_ref[...]                             # (256 or 512, 1) f32
    value = jnp.sum(va[:_H] * wh[:_H], axis=0, keepdims=True) + bh_ref[0:1, :]

    if wva_ref.shape[0] > _H:
        # Faithful (mathematically dead) adv stream, mirrored literally from
        # the PyTorch forward: mean over a size-1 axis equals adv itself.
        adv = jnp.sum(va[_H:] * wh[_H:], axis=0, keepdims=True) + bh_ref[1:2, :]
        adv_avg = jnp.mean(adv, axis=0, keepdims=True)
        value = value + adv - adv_avg

    q_ref[...] = value.astype(q_ref.dtype)       # (1, tile_b): lane-dense store


def dueling_dqn_forward(x, params, *, tile_b=2048, use_bf16=True, faithful=False):
    """x: (B, 4) float32.  params: PyTorch-layout weights (out,in), biases (out,1)."""
    (w1, b1, w2, b2, wv1, bv1, wa1, ba1, wv2, bv2, wa2, ba2) = params

    if faithful:
        # Keep the dead adv stream (bit-faithful to the PyTorch compute graph).
        wva = jnp.concatenate([wv1, wa1], axis=0)        # (512, 64)
        bva = jnp.concatenate([bv1, ba1], axis=0)        # (512, 1)
        wh = jnp.concatenate([wv2.T, wa2.T], axis=0)     # (512, 1)
        bh = jnp.concatenate([bv2, ba2], axis=0)         # (2, 1)
    else:
        # adv - mean(adv, dim=1) == 0 exactly for a (B,1) adv, so Q == value.
        wva, bva, wh, bh = wv1, bv1, wv2.T, bv2          # (256,64),(256,1),(256,1),(1,1)

    # MXU operand dtype; accumulation and all epilogues stay f32.
    mm_dtype = jnp.bfloat16 if use_bf16 else jnp.float32
    w2c = w2.astype(mm_dtype)
    wvac = wva.astype(mm_dtype)

    # ---- Batch-in-lanes tiling: x^T is (4, Bp), q is (1, Bp). ----
    B = x.shape[0]
    tile_b = _round_up(max(128, min(tile_b, _round_up(B, 128))), 128)
    # v7x megacore: prefer >= 2 grid steps so both TensorCores get work.
    if _round_up(B, tile_b) // tile_b < 2 and _round_up(B, 128) >= 256:
        tile_b = _round_up(_round_up(B, 128) // 2, 128)
    Bp = _round_up(B, tile_b)
    xT = x.T if Bp == B else jnp.pad(x.T, ((0, 0), (0, Bp - B)))
    grid = (Bp // tile_b,)

    def full(a):  # whole-array block, VMEM-resident across the grid
        return pl.BlockSpec(a.shape, lambda i: (0,) * a.ndim)

    q_row = pl.pallas_call(
        dueling_dqn_kernel,
        out_shape=jax.ShapeDtypeStruct((1, Bp), jnp.float32),
        grid=grid,
        in_specs=[
            pl.BlockSpec((4, tile_b), lambda i: (0, i)),   # x^T tiled over batch lanes
            full(w1), full(b1),
            full(w2c), full(b2),
            full(wvac), full(bva),
            full(wh), full(bh),
        ],
        out_specs=pl.BlockSpec((1, tile_b), lambda i: (0, i)),
        compiler_params=pltpu.CompilerParams(
            dimension_semantics=("parallel",),             # megacore on v7x
            vmem_limit_bytes=48 * 1024 * 1024,             # headroom, < v7x 64 MiB
        ),
    )(xT, w1, b1, w2c, b2, wvac, bva, wh, bh)

    # Padded batch columns are computed then sliced off (harmless).
    return q_row.T[:B]                                     # (B, 1)


def _xavier_uniform(key, fan_out, fan_in):
    bound = (6.0 / (fan_in + fan_out)) ** 0.5
    return jax.random.uniform(
        key, (fan_out, fan_in), dtype=jnp.float32, minval=-bound, maxval=bound
    )


def init_params(key):
    """Xavier-uniform weights (PyTorch (out,in) layout), zero (out,1) biases."""
    keys = jax.random.split(key, 6)
    layer_dims = [
        (64, 4),     # conv1
        (64, 64),    # conv2
        (256, 64),   # fc_value
        (256, 64),   # fc_adv
        (1, 256),    # value
        (1, 256),    # adv
    ]
    params = []
    for k, (fo, fi) in zip(keys, layer_dims):
        params.append(_xavier_uniform(k, fo, fi))
        params.append(jnp.zeros((fo, 1), dtype=jnp.float32))
    return params


def reference_forward(x, params):
    """Plain-JAX reference matching the PyTorch forward semantics."""
    w1, b1, w2, b2, wv1, bv1, wa1, ba1, wv2, bv2, wa2, ba2 = params
    h = jnp.maximum(x @ w1.T + b1.T, 0.0)
    h = jnp.maximum(h @ w2.T + b2.T, 0.0)
    v = jnp.maximum(h @ wv1.T + bv1.T, 0.0)
    a = jnp.maximum(h @ wa1.T + ba1.T, 0.0)
    value = v @ wv2.T + bv2.T
    adv = a @ wa2.T + ba2.T
    adv_avg = jnp.mean(adv, axis=1, keepdims=True)
    return value + adv - adv_avg


if __name__ == "__main__":
    key = jax.random.PRNGKey(0)
    k_x, k_p = jax.random.split(key)

    B = 300                                    # not a lane multiple: exercises padding + 2-step grid
    x = jax.random.normal(k_x, (B, 4), dtype=jnp.float32)
    params = init_params(k_p)
    q_ref = reference_forward(x, params)

    # Default path: bf16 MXU operands, f32 accumulation, dead adv stream dropped.
    q = jax.block_until_ready(dueling_dqn_forward(x, params))
    assert q.shape == (B, 1), q.shape
    assert jnp.allclose(q, q_ref, atol=5e-2, rtol=5e-2)

    # f32 MXU path (tight tolerance against the reference).
    q32 = jax.block_until_ready(dueling_dqn_forward(x, params, use_bf16=False))
    assert q32.shape == (B, 1), q32.shape
    assert jnp.allclose(q32, q_ref, atol=1e-5, rtol=1e-5)

    # Faithful path: full adv stream computed literally as in the PyTorch forward.
    qf = jax.block_until_ready(
        dueling_dqn_forward(x, params, use_bf16=False, faithful=True)
    )
    assert qf.shape == (B, 1), qf.shape
    assert jnp.allclose(qf, q_ref, atol=1e-5, rtol=1e-5)

    print("KERNEL_OK")
</pallas_src>

<mosaic_0001>
module attributes {stable_mosaic.version = 11 : i64} {
  func.func @dueling_dqn_kernel(%arg0: i32, %arg1: memref<4x256xf32, #tpu.memory_space<vmem>>, %arg2: memref<64x4xf32, #tpu.memory_space<vmem>>, %arg3: memref<64x1xf32, #tpu.memory_space<vmem>>, %arg4: memref<64x64xbf16, #tpu.memory_space<vmem>>, %arg5: memref<64x1xf32, #tpu.memory_space<vmem>>, %arg6: memref<256x64xbf16, #tpu.memory_space<vmem>>, %arg7: memref<256x1xf32, #tpu.memory_space<vmem>>, %arg8: memref<256x1xf32, #tpu.memory_space<vmem>>, %arg9: memref<1x1xf32, #tpu.memory_space<vmem>>, %arg10: memref<1x256xf32, #tpu.memory_space<vmem>>) attributes {dimension_semantics = [#tpu.dimension_semantics<parallel>], iteration_bounds = array<i64: 2>, scalar_prefetch = 0 : i64, scratch_operands = 0 : i64, tpu.core_type = #tpu.core_type<tc>, window_params = [{transform_indices = @transform_0, window_bounds = array<i64: 4, 256>}, {pipeline_mode = #tpu.pipeline_mode<synchronous>, transform_indices = @transform_1, window_bounds = array<i64: 64, 4>}, {pipeline_mode = #tpu.pipeline_mode<synchronous>, transform_indices = @transform_2, window_bounds = array<i64: 64, 1>}, {pipeline_mode = #tpu.pipeline_mode<synchronous>, transform_indices = @transform_3, window_bounds = array<i64: 64, 64>}, {pipeline_mode = #tpu.pipeline_mode<synchronous>, transform_indices = @transform_4, window_bounds = array<i64: 64, 1>}, {pipeline_mode = #tpu.pipeline_mode<synchronous>, transform_indices = @transform_5, window_bounds = array<i64: 256, 64>}, {pipeline_mode = #tpu.pipeline_mode<synchronous>, transform_indices = @transform_6, window_bounds = array<i64: 256, 1>}, {pipeline_mode = #tpu.pipeline_mode<synchronous>, transform_indices = @transform_7, window_bounds = array<i64: 256, 1>}, {pipeline_mode = #tpu.pipeline_mode<synchronous>, transform_indices = @transform_8, window_bounds = array<i64: 1, 1>}, {transform_indices = @transform_9, window_bounds = array<i64: 1, 256>}]} {
    %c0 = arith.constant 0 : index
    %c0_0 = arith.constant 0 : index
    %0 = vector.load %arg1[%c0, %c0_0] : memref<4x256xf32, #tpu.memory_space<vmem>>, vector<4x256xf32>
    %c0_1 = arith.constant 0 : index
    %c0_2 = arith.constant 0 : index
    %1 = vector.load %arg2[%c0_1, %c0_2] : memref<64x4xf32, #tpu.memory_space<vmem>>, vector<64x4xf32>
    %c0_3 = arith.constant 0 : index
    %c0_4 = arith.constant 0 : index
    %2 = vector.load %arg3[%c0_3, %c0_4] : memref<64x1xf32, #tpu.memory_space<vmem>>, vector<64x1xf32>
    %3 = vector.extract_strided_slice %1 {offsets = [0, 0], sizes = [64, 1], strides = [1, 1]} : vector<64x4xf32> to vector<64x1xf32>
    %4 = vector.extract_strided_slice %0 {offsets = [0, 0], sizes = [1, 256], strides = [1, 1]} : vector<4x256xf32> to vector<1x256xf32>
    %5 = vector.broadcast %3 : vector<64x1xf32> to vector<64x256xf32>
    %6 = vector.broadcast %4 : vector<1x256xf32> to vector<64x256xf32>
    %7 = arith.mulf %5, %6 : vector<64x256xf32>
    %8 = vector.broadcast %2 : vector<64x1xf32> to vector<64x256xf32>
    %9 = arith.addf %8, %7 : vector<64x256xf32>
    %10 = vector.extract_strided_slice %1 {offsets = [0, 1], sizes = [64, 1], strides = [1, 1]} : vector<64x4xf32> to vector<64x1xf32>
    %11 = vector.extract_strided_slice %0 {offsets = [1, 0], sizes = [1, 256], strides = [1, 1]} : vector<4x256xf32> to vector<1x256xf32>
    %12 = vector.broadcast %10 : vector<64x1xf32> to vector<64x256xf32>
    %13 = vector.broadcast %11 : vector<1x256xf32> to vector<64x256xf32>
    %14 = arith.mulf %12, %13 : vector<64x256xf32>
    %15 = arith.addf %9, %14 : vector<64x256xf32>
    %16 = vector.extract_strided_slice %1 {offsets = [0, 2], sizes = [64, 1], strides = [1, 1]} : vector<64x4xf32> to vector<64x1xf32>
    %17 = vector.extract_strided_slice %0 {offsets = [2, 0], sizes = [1, 256], strides = [1, 1]} : vector<4x256xf32> to vector<1x256xf32>
    %18 = vector.broadcast %16 : vector<64x1xf32> to vector<64x256xf32>
    %19 = vector.broadcast %17 : vector<1x256xf32> to vector<64x256xf32>
    %20 = arith.mulf %18, %19 : vector<64x256xf32>
    %21 = arith.addf %15, %20 : vector<64x256xf32>
    %22 = vector.extract_strided_slice %1 {offsets = [0, 3], sizes = [64, 1], strides = [1, 1]} : vector<64x4xf32> to vector<64x1xf32>
    %23 = vector.extract_strided_slice %0 {offsets = [3, 0], sizes = [1, 256], strides = [1, 1]} : vector<4x256xf32> to vector<1x256xf32>
    %24 = vector.broadcast %22 : vector<64x1xf32> to vector<64x256xf32>
    %25 = vector.broadcast %23 : vector<1x256xf32> to vector<64x256xf32>
    %26 = arith.mulf %24, %25 : vector<64x256xf32>
    %27 = arith.addf %21, %26 : vector<64x256xf32>
    %cst = arith.constant 0.000000e+00 : f32
    %28 = vector.broadcast %cst : f32 to vector<64x256xf32>
    %29 = arith.maximumf %27, %28 : vector<64x256xf32>
    %c0_5 = arith.constant 0 : index
    %c0_6 = arith.constant 0 : index
    %30 = vector.load %arg4[%c0_5, %c0_6] : memref<64x64xbf16, #tpu.memory_space<vmem>>, vector<64x64xbf16>
    %31 = arith.truncf %29 : vector<64x256xf32> to vector<64x256xbf16>
    %cst_7 = arith.constant dense<0.000000e+00> : vector<64x256xf32>
    %32 = tpu.matmul %30, %31, %cst_7 {dimension_numbers = #tpu.dot_dimension_numbers<[1], [0], [0], [1], [0, 0, 1, 1], [], []>} : vector<64x64xbf16>, vector<64x256xbf16>, vector<64x256xf32> -> vector<64x256xf32>
    %c0_8 = arith.constant 0 : index
    %c0_9 = arith.constant 0 : index
    %33 = vector.load %arg5[%c0_8, %c0_9] : memref<64x1xf32, #tpu.memory_space<vmem>>, vector<64x1xf32>
    %34 = vector.broadcast %33 : vector<64x1xf32> to vector<64x256xf32>
    %35 = arith.addf %32, %34 : vector<64x256xf32>
    %cst_10 = arith.constant 0.000000e+00 : f32
    %36 = vector.broadcast %cst_10 : f32 to vector<64x256xf32>
    %37 = arith.maximumf %35, %36 : vector<64x256xf32>
    %c0_11 = arith.constant 0 : index
    %c0_12 = arith.constant 0 : index
    %38 = vector.load %arg6[%c0_11, %c0_12] : memref<256x64xbf16, #tpu.memory_space<vmem>>, vector<256x64xbf16>
    %39 = arith.truncf %37 : vector<64x256xf32> to vector<64x256xbf16>
    %cst_13 = arith.constant dense<0.000000e+00> : vector<256x256xf32>
    %40 = tpu.matmul %38, %39, %cst_13 {dimension_numbers = #tpu.dot_dimension_numbers<[1], [0], [0], [1], [0, 0, 1, 1], [], []>} : vector<256x64xbf16>, vector<64x256xbf16>, vector<256x256xf32> -> vector<256x256xf32>
    %c0_14 = arith.constant 0 : index
    %c0_15 = arith.constant 0 : index
    %41 = vector.load %arg7[%c0_14, %c0_15] : memref<256x1xf32, #tpu.memory_space<vmem>>, vector<256x1xf32>
    %42 = vector.broadcast %41 : vector<256x1xf32> to vector<256x256xf32>
    %43 = arith.addf %40, %42 : vector<256x256xf32>
    %cst_16 = arith.constant 0.000000e+00 : f32
    %44 = vector.broadcast %cst_16 : f32 to vector<256x256xf32>
    %45 = arith.maximumf %43, %44 : vector<256x256xf32>
    %c0_17 = arith.constant 0 : index
    %c0_18 = arith.constant 0 : index
    %46 = vector.load %arg8[%c0_17, %c0_18] : memref<256x1xf32, #tpu.memory_space<vmem>>, vector<256x1xf32>
    %47 = vector.broadcast %46 : vector<256x1xf32> to vector<256x256xf32>
    %48 = arith.mulf %45, %47 : vector<256x256xf32>
    %cst_19 = arith.constant dense<0.000000e+00> : vector<256xf32>
    %49 = vector.multi_reduction <add>, %48, %cst_19 [0] : vector<256x256xf32> to vector<256xf32>
    %50 = vector.shape_cast %49 : vector<256xf32> to vector<1x256xf32>
    %c0_20 = arith.constant 0 : index
    %c0_21 = arith.constant 0 : index
    %51 = vector.load %arg9[%c0_20, %c0_21] : memref<1x1xf32, #tpu.memory_space<vmem>>, vector<1x1xf32>
    %52 = vector.broadcast %51 : vector<1x1xf32> to vector<1x256xf32>
    %53 = arith.addf %50, %52 : vector<1x256xf32>
    %c0_22 = arith.constant 0 : index
    %c0_23 = arith.constant 0 : index
    %54 = vector.load %arg10[%c0_22, %c0_23] : memref<1x256xf32, #tpu.memory_space<vmem>>, vector<1x256xf32>
    tpu.vector_store %arg10[%c0_22, %c0_23], %53 {strides = array<i32>} : memref<1x256xf32, #tpu.memory_space<vmem>>, vector<1x256xf32>,
    return
  }
  func.func @transform_0(%arg0: i32) -> (i32, i32) {
    %c0_i32 = arith.constant 0 : i32
    %c0_i32_0 = arith.constant 0 : i32
    return %c0_i32, %arg0 : i32, i32
  }
  func.func @transform_1(%arg0: i32) -> (i32, i32) {
    %c0_i32 = arith.constant 0 : i32
    %c0_i32_0 = arith.constant 0 : i32
    %c0_i32_1 = arith.constant 0 : i32
    return %c0_i32, %c0_i32_0 : i32, i32
  }
  func.func @transform_2(%arg0: i32) -> (i32, i32) {
    %c0_i32 = arith.constant 0 : i32
    %c0_i32_0 = arith.constant 0 : i32
    %c0_i32_1 = arith.constant 0 : i32
    return %c0_i32, %c0_i32_0 : i32, i32
  }
  func.func @transform_3(%arg0: i32) -> (i32, i32) {
    %c0_i32 = arith.constant 0 : i32
    %c0_i32_0 = arith.constant 0 : i32
    %c0_i32_1 = arith.constant 0 : i32
    return %c0_i32, %c0_i32_0 : i32, i32
  }
  func.func @transform_4(%arg0: i32) -> (i32, i32) {
    %c0_i32 = arith.constant 0 : i32
    %c0_i32_0 = arith.constant 0 : i32
    %c0_i32_1 = arith.constant 0 : i32
    return %c0_i32, %c0_i32_0 : i32, i32
  }
  func.func @transform_5(%arg0: i32) -> (i32, i32) {
    %c0_i32 = arith.constant 0 : i32
    %c0_i32_0 = arith.constant 0 : i32
    %c0_i32_1 = arith.constant 0 : i32
    return %c0_i32, %c0_i32_0 : i32, i32
  }
  func.func @transform_6(%arg0: i32) -> (i32, i32) {
    %c0_i32 = arith.constant 0 : i32
    %c0_i32_0 = arith.constant 0 : i32
    %c0_i32_1 = arith.constant 0 : i32
    return %c0_i32, %c0_i32_0 : i32, i32
  }
  func.func @transform_7(%arg0: i32) -> (i32, i32) {
    %c0_i32 = arith.constant 0 : i32
    %c0_i32_0 = arith.constant 0 : i32
    %c0_i32_1 = arith.constant 0 : i32
    return %c0_i32, %c0_i32_0 : i32, i32
  }
  func.func @transform_8(%arg0: i32) -> (i32, i32) {
    %c0_i32 = arith.constant 0 : i32
    %c0_i32_0 = arith.constant 0 : i32
    %c0_i32_1 = arith.constant 0 : i32
    return %c0_i32, %c0_i32_0 : i32, i32
  }
  func.func @transform_9(%arg0: i32) -> (i32, i32) {
    %c0_i32 = arith.constant 0 : i32
    %c0_i32_0 = arith.constant 0 : i32
    return %c0_i32, %arg0 : i32, i32
  }
}

</mosaic_0001>

<bundles_post_ra>
// kernel: tpu_custom_call.1
= control target key start
LH: loop header
LB: loop body
LE: loop exit
PB: predicated region body
PF: predicated region fallthrough
CT: control target
= control target key end

     0   :  { %s3118_s0 = inlined_call_operand.vmem [shape: f32[4,512], index: 0, kind: input, shape index: {}]   ;;  %s3119_s1 = inlined_call_operand.vmem [shape: f32[64,4], index: 1, kind: input, shape index: {}]   ;;  %s3120_s2 = inlined_call_operand.vmem [shape: f32[64,1], index: 2, kind: input, shape index: {}]   ;;  %s3121_s3 = inlined_call_operand.vmem [shape: bf16[64,64], index: 3, kind: input, shape index: {}]   ;;  %s3122_s4 = inlined_call_operand.vmem [shape: f32[64,1], index: 4, kind: input, shape index: {}]   ;;  %s3123_s5 = inlined_call_operand.vmem [shape: bf16[256,64], index: 5, kind: input, shape index: {}]   ;;  %s3124_s6 = inlined_call_operand.vmem [shape: f32[256,1], index: 6, kind: input, shape index: {}]   ;;  %s3125_s7 = inlined_call_operand.vmem [shape: f32[256,1], index: 7, kind: input, shape index: {}]   ;;  %s3126_s8 = inlined_call_operand.<no memory space> [shape: f32[1,1], index: 8, kind: input, shape index: {}]   ;;  %s3127_s9 = inlined_call_operand.hbm [shape: f32[1,512], index: 9, kind: output, shape index: {}]  }
   0x1   :  { %v14_v0 = vstv %s3126_s8 }
   0x2   :  { %15 = vst [vmem:[#allocation2] sm:$0x1] %v14_v0 }
   0x3   :  { %16 = vsyncpa [#allocation4], 0 }
   0x4   :  { %18 = vsyncpa [#allocation4 + $0x1], 0  ;;  %s2247_s11 = smov 0   ;;  %s2249_s12 = smov 0  }
   0x5   :  { %s2251_s13 = smov 0   ;;  %s2253_s14 = smov 0  }
   0x6 LB: > { %s1896_s8 = sadd.s32 4294967295, %s2188_s14   ;;  %s1897_s15 = sadd.s32 4294967294, %s2188_s14   ;;  %s2188_s14 = sphi %s2253_s14, %s3196_s14   ;;  %s2184_s13 = sphi %s2251_s13, %s3195_s13   ;;  %s2180_s12 = sphi %s2249_s12, %s3194_s12   ;;  %s2176_s11 = sphi %s2247_s11, %s3193_s11  }
   0x7   : > { %s2270_s16 = sadd.s32 1, %s2188_s14   ;;  %s225_s17 = sadd.s32 1, %s2184_s13 }
   0x8   : > { %s222_s18 = ssub.s32 %s2188_s14, %s2270_s16  ;;  %p235_p0 = scmp.ne.s32.totalorder %s2184_s13, %s2180_s12 }
   0x9   : > { %p223_p1 = scmp.eq.s32.totalorder %s222_s18, 0  ;;  %p236_p2 = scmp.eq.s32.totalorder %s1896_s8, 1 }
   0xa   : > { %p241_p3 = scmp.ne.s32.totalorder %s2180_s12, %s2176_s11  ;;  %p242_p4 = scmp.eq.s32.totalorder %s1897_s15, 1 }
   0xb   : > { %s2282_s19 = scalar_select %p223_p1, %s2184_s13, %s225_s17  }
   0xc   : > { %p2284_p5 = por %p236_p2, %p235_p0  ;;  %p2288_p6 = por %p242_p4, %p241_p3 }
   0xd   : > { %p1900_p7 = scmp.ge.s32.totalorder %s2188_s14, 1  ;;  %p293_p8 = scmp.lt.s32.totalorder %s2188_s14, 3 }
   0xf   : > { %p294_p9 = pnand %p1900_p7, %p293_p8 }
  0x11   : > { %297 = sbr.rel (%p294_p9) target bundleno = 790 (0x316), region = 56 }
  0x16   : > { %v2297_v1 = vld [vmem:[%s3119_s1 + $0x20] sm:$0xff]  ;;  %v2302_v2 = vld [vmem:[%s3119_s1 + $0x10] sm:$0xff]  ;;  %v2190_v4 = vmov 0   ;;  %v343_v5 = vld [vmem:[%s3119_s1 + $0x28] sm:$0xff]  ;;  %v2191_v18 = vmov 1   ;;  %v2192_v19 = vmov 3  }
  0x17   : > { %v2307_v3 = vld [vmem:[%s3119_s1] sm:$0xff]  ;;  %2101 = vset.pattern.permute.xlu2 %v2190_v4  ;;  %2100 = vset.pattern.permute.xlu1 %v2190_v4  ;;  %v2321_v6 = vld [vmem:[%s3119_s1 + $0x18] sm:$0xff]  ;;  %v2326_v7 = vld [vmem:[%s3119_s1 + $0x8] sm:$0xff]  ;;  %v2193_v20 = vmov 2   ;;  %s2374_s28 = sshll.u32 %s1896_s8, 1  ;;  %vm783_vm0 = vcmask 523264  }
  0x18   : > { %2099 = vset.pattern.permute.xlu0 %v2190_v4  ;;  %376 = vperm.xlu2 %2101, %v2297_v1   ;;  %v346_v8 = vld [vmem:[%s3120_s2] sm:$0xff]  ;;  %v345_v9 = vld [vmem:[%s3119_s1 + $0x38] sm:$0xff]  ;;  %v344_v10 = vld [vmem:[%s3119_s1 + $0x30] sm:$0xff]  ;;  %p330_p10 = scmp.lt.s32.totalorder %s2374_s28, 3  ;;  %s326_s22 = sand.u32 1, %s2180_s12   ;;  %vm1814_vm1 = vcmask 1040384  }
  0x19   : > { %366 = vperm.xlu1 %2100, %v2302_v2   ;;  %356 = vperm.xlu0 %2099, %v2307_v3   ;;  %v349_v11 = vld [vmem:[%s3120_s2 + $0x18] sm:$0xff]  ;;  %v348_v12 = vld [vmem:[%s3120_s2 + $0x10] sm:$0xff]  ;;  %v347_v13 = vld [vmem:[%s3120_s2 + $0x8] sm:$0xff]  ;;  %s1833_s26 = scalar_lea.hbm %s3127_s9, %s2374_s28  ;;  %s2146_s18 = scalar_lea.hbm %s3127_s9, 4 }
  0x1a   : > { %v352_v14 = vld [vmem:[%s3120_s2 + $0x30] sm:$0xff]  ;;  %v351_v15 = vld [vmem:[%s3120_s2 + $0x28] sm:$0xff]  ;;  %v350_v16 = vld [vmem:[%s3120_s2 + $0x20] sm:$0xff]  ;;  %s331_s10 = scalar_select %p330_p10, %s2374_s28, 3 }
  0x1b   : > { %v353_v17 = vld [vmem:[%s3120_s2 + $0x38] sm:$0xff]  ;;  %v716_v21 = vld [vmem:[%s3122_s4 + $0x8] sm:$0xff]  ;;  %v721_v23 = vld [vmem:[%s3122_s4 + $0x30] sm:$0xff]  ;;  %s1837_s30 = sshll.u32 %s1833_s26, 4  ;;  %s1838_s30 = int_to_ptr.hbm [resolvable:$true] %s1837_s30 }
  0x1c   : > { %s1903_s17 = sshll.u32 %s331_s10, 2  ;;  %v911_v26 = vld [vmem:[%s3124_s6 + $0x8] sm:$0xff]  ;;  %v914_v36 = vld [vmem:[%s3124_s6 + $0x20] sm:$0xff]  ;;  %v917_v44 = vld [vmem:[%s3124_s6 + $0x38] sm:$0xff]  ;;  %s1823_s10 = scalar_lea.sflag [#allocation4], %s326_s22 }
  0x1d   : > { %s333_s23 = scalar_lea.vmem %s3118_s0, %s1903_s17  ;;  %v715_v39 = vld [vmem:[%s3122_s4] sm:$0xff]  ;;  %v718_v48 = vld [vmem:[%s3122_s4 + $0x18] sm:$0xff]  ;;  %v717_v49 = vld [vmem:[%s3122_s4 + $0x10] sm:$0xff]  ;;  %s2140_s8 = sshra.s32 %s1838_s30, 4  ;;  %s2141_s8 = int_to_ptr.hbm [resolvable:$true] %s2140_s8 }
  0x1e   : > { %v2398_v25 = vld [vmem:[%s333_s23] sm:$0xff]  ;;  %v920_v52 = vld [vmem:[%s3124_s6 + $0x50] sm:$0xff]  ;;  %v720_v56 = vld [vmem:[%s3122_s4 + $0x28] sm:$0xff]  ;;  %s1901_s23 = sshll.u32 %s326_s22, 1  ;;  %s2142_s28 = scalar_lea.hbm %s2141_s8, 2 }
  0x1f   : > { %v395_v27 = vperm.slane %v2398_v25, 0  ;;  %v396_v28 = vperm.slane %v2398_v25, 4  ;;  %v719_v59 = vld [vmem:[%s3122_s4 + $0x20] sm:$0xff]  ;;  %s328_s27 = scalar_lea.vmem [#allocation3], %s1901_s23  ;;  %p2143_p11 = scmp.ne.s32.totalorder %s2141_s8, %s2142_s28 }
  0x20   : > { %381 = vperm.xlu2 %2101, %v343_v5   ;;  %s1835_s29 = sshll.u32 %s328_s27, 4  ;;  %p2147_p0 = scmp.lt.s32.totalorder %s2141_s8, %s3127_s9  ;;  %s1836_s29 = int_to_ptr.vmem [resolvable:$true] %s1835_s29 }
  0x21   : > { %371 = vperm.xlu1 %2100, %v2321_v6   ;;  %361 = vperm.xlu0 %2099, %v2326_v7   ;;  %v2405_v29 = vperm.slane %v395_v27, 0  ;;  %v2407_v30 = vperm.slane %v396_v28, 0  ;;  %v915_v27 = vld [vmem:[%s3124_s6 + $0x28] sm:$0xff]  ;;  %v932_v28 = vld [vmem:[%s3124_s6 + $0xb0] sm:$0xff]  ;;  %p2144_p12 = pnand %p2143_p11, %p2284_p5  ;;  %p2148_p1 = scmp.lt.s32.totalorder %s2146_s18, %s2142_s28 }
  0x23   : > { %p2145_p13 = pneg %p2144_p12  ;;  %p2149_p2 = por %p2148_p1, %p2147_p0 }
  0x25   : > { %p2150_p3 = pnand %p2149_p2, %p2145_p13 }
  0x28   : > { %419 = vperm.xlu2 %2101, %v346_v8   ;;  %v926_v8 = vld [vmem:[%s3124_s6 + $0x80] sm:$0xff] }
  0x29   : > { %391 = vperm.xlu1 %2100, %v345_v9   ;;  %386 = vperm.xlu0 %2099, %v344_v10  }
  0x30   : > { %434 = vperm.xlu2 %2101, %v349_v11   ;;  %v913_v11 = vld [vmem:[%s3124_s6 + $0x18] sm:$0xff] }
  0x31   : > { %429 = vperm.xlu1 %2100, %v348_v12   ;;  %424 = vperm.xlu0 %2099, %v347_v13   ;;  %v912_v12 = vld [vmem:[%s3124_s6 + $0x10] sm:$0xff] }
  0x38   : > { %449 = vperm.xlu2 %2101, %v352_v14  }
  0x39   : > { %444 = vperm.xlu1 %2100, %v351_v15   ;;  %439 = vperm.xlu0 %2099, %v350_v16   ;;  %v929_v16 = vld [vmem:[%s3124_s6 + $0x98] sm:$0xff] }
  0x40   : > { %2103 = vset.pattern.permute.xlu2 %v2191_v18 }
  0x41   : > { %2102 = vset.pattern.permute.xlu1 %v2191_v18  ;;  %454 = vperm.xlu0 %2099, %v353_v17  }
  0x42   : > { %498 = vperm.xlu2 %2103, %v344_v10   ;;  %474 = vperm.xlu1 %2102, %v2307_v3  }
  0x49   : > { %2108 = vset.pattern.permute.xlu0 %v2192_v19 }
  0x4a   : > { %2105 = vset.pattern.permute.xlu2 %v2193_v20  ;;  %2104 = vset.pattern.permute.xlu1 %v2193_v20 }
  0x4b   : > { %638 = vperm.xlu0 %2108, %v344_v10   ;;  %572 = vperm.xlu2 %2105, %v345_v9  }
  0x4c   : > { %568 = vperm.xlu1 %2104, %v344_v10   ;;  %v506_v10 = vperm.slane %v2398_v25, 5 }
  0x4e   : > { %v2493_v14 = vperm.slane %v506_v10, 1 }
  0x53   : > { %2109 = vset.pattern.permute.xlu0 %v2191_v18  ;;  %2107 = vset.pattern.permute.xlu2 %v2191_v18 }
  0x54   : > { %2106 = vset.pattern.permute.xlu1 %v2191_v18  ;;  %502 = vperm.xlu0 %2109, %v345_v9  }
  0x55   : > { %494 = vperm.xlu2 %2107, %v343_v5   ;;  %490 = vperm.xlu1 %2106, %v2297_v1  }
  0x5c   : > { %486 = vperm.xlu0 %2109, %v2321_v6  }
  0x5d   : > { %2111 = vset.pattern.permute.xlu2 %v2193_v20  ;;  %2110 = vset.pattern.permute.xlu1 %v2192_v19 }
  0x5e   : > { %560 = vperm.xlu2 %2111, %v2297_v1   ;;  %642 = vperm.xlu1 %2110, %v345_v9   ;;  %v505_v9 = vperm.slane %v2398_v25, 1 }
  0x60   : > { %v2491_v13 = vperm.slane %v505_v9, 1 }
  0x64   : > { %478 = vperm.xlu0 %2109, %v2326_v7  }
  0x66   : > { %2113 = vset.pattern.permute.xlu2 %v2191_v18  ;;  %2112 = vset.pattern.permute.xlu1 %v2193_v20 }
  0x67   : > { %482 = vperm.xlu2 %2113, %v2302_v2   ;;  %564 = vperm.xlu1 %2112, %v343_v5  }
  0x6c   : > { %2120 = vset.pattern.permute.xlu0 %v2193_v20 }
  0x6d   : > { %544 = vperm.xlu0 %2120, %v2307_v3  }
  0x6f   : > { %2115 = vset.pattern.permute.xlu2 %v2192_v19  ;;  %2114 = vset.pattern.permute.xlu1 %v2192_v19 }
  0x70   : > { %634 = vperm.xlu2 %2115, %v343_v5   ;;  %630 = vperm.xlu1 %2114, %v2297_v1   ;;  %v722_v5 = vld [vmem:[%s3122_s4 + $0x38] sm:$0xff] }
  0x72   : > { %v2381_v22 = vpop.permute.xlu2 %376 }
  0x75   : > { %2124 = vset.pattern.permute.xlu0 %v2190_v4 }
  0x76   : > { %730 = vperm.xlu0 %2124, %v716_v21  }
  0x78   : > { %2117 = vset.pattern.permute.xlu2 %v2193_v20  ;;  %2116 = vset.pattern.permute.xlu1 %v2193_v20 }
  0x79   : > { %556 = vperm.xlu2 %2117, %v2321_v6   ;;  %552 = vperm.xlu1 %2116, %v2302_v2  }
  0x7a   : > { %v2392_v24 = vpop.permute.xlu2 %381 }
  0x7e   : > { %755 = vperm.xlu0 %2124, %v721_v23  }
  0x81   : > { %2119 = vset.pattern.permute.xlu2 %v2192_v19  ;;  %2118 = vset.pattern.permute.xlu1 %v2192_v19 }
  0x82   : > { %626 = vperm.xlu2 %2119, %v2321_v6   ;;  %622 = vperm.xlu1 %2118, %v2302_v2   ;;  %v420_v31 = vpop.permute.xlu2 %419  ;;  %v923_v2 = vld [vmem:[%s3124_s6 + $0x68] sm:$0xff] }
  0x86   : > { %949 = vperm.xlu0 %2124, %v911_v26   ;;  %v916_v26 = vld [vmem:[%s3124_s6 + $0x30] sm:$0xff] }
  0x8a   : > { %614 = vperm.xlu2 %2119, %v2307_v3   ;;  %2121 = vset.pattern.permute.xlu1 %v2193_v20  ;;  %v435_v45 = vpop.permute.xlu2 %434  ;;  %v910_v3 = vld [vmem:[%s3124_s6] sm:$0xff] }
  0x8b   : > { %548 = vperm.xlu1 %2121, %v2326_v7   ;;  %v367_v32 = vpop.permute.xlu1 %366  ;;  %v357_v33 = vpop.permute.xlu0 %356 }
  0x8c   : > { %v401_v34 = vmul.f32 %v2405_v29, %v357_v33  ;;  %v402_v35 = vmul.f32 %v2407_v30, %v357_v33  ;;  %v405_v57 = vmul.f32 %v2405_v29, %v367_v32  ;;  %v406_v58 = vmul.f32 %v2407_v30, %v367_v32 }
  0x8e   : > { %v2416_v37 = vadd.f32 %v420_v31, %v401_v34  ;;  %v2418_v38 = vadd.f32 %v420_v31, %v402_v35  ;;  %964 = vperm.xlu0 %2124, %v914_v36   ;;  %v575_v34 = vperm.slane %v2398_v25, 2  ;;  %v576_v35 = vperm.slane %v2398_v25, 6  ;;  %v919_v36 = vld [vmem:[%s3124_s6 + $0x48] sm:$0xff] }
  0x92   : > { %2123 = vset.pattern.permute.xlu2 %v2190_v4  ;;  %v2449_v55 = vpop.permute.xlu2 %449 }
  0x93   : > { %2122 = vset.pattern.permute.xlu1 %v2192_v19  ;;  %v372_v40 = vpop.permute.xlu1 %371  ;;  %v362_v41 = vpop.permute.xlu0 %361  ;;  %725 = vperm.xlu2 %2123, %v715_v39   ;;  %v918_v39 = vld [vmem:[%s3124_s6 + $0x40] sm:$0xff] }
  0x94   : > { %v407_v42 = vmul.f32 %v2405_v29, %v372_v40  ;;  %v408_v43 = vmul.f32 %v2407_v30, %v372_v40  ;;  %618 = vperm.xlu1 %2122, %v2326_v7   ;;  %v403_v53 = vmul.f32 %v2405_v29, %v362_v41  ;;  %v404_v54 = vmul.f32 %v2407_v30, %v362_v41 }
  0x95   : > { %v2527_v40 = vperm.slane %v575_v34, 2  ;;  %v2529_v41 = vperm.slane %v576_v35, 2 }
  0x96   : > { %v2431_v46 = vadd.f32 %v435_v45, %v407_v42  ;;  %v2433_v47 = vadd.f32 %v435_v45, %v408_v43  ;;  %979 = vperm.xlu0 %2124, %v917_v44   ;;  %v645_v42 = vperm.slane %v2398_v25, 3  ;;  %v646_v43 = vperm.slane %v2398_v25, 7  ;;  %v935_v44 = vld [vmem:[%s3124_s6 + $0xc8] sm:$0xff] }
  0x9b   : > { %v2441_v50 = vpop.permute.xlu1 %391  ;;  %v387_v51 = vpop.permute.xlu0 %386  ;;  %740 = vperm.xlu2 %2123, %v718_v48  }
  0x9c   : > { %2125 = vset.pattern.permute.xlu1 %v2190_v4  ;;  %v499_v4 = vpop.permute.xlu2 %498 }
  0x9d   : > { %735 = vperm.xlu1 %2125, %v717_v49   ;;  %v523_v49 = vmul.f32 %v2491_v13, %v499_v4 }
  0x9e   : > { %994 = vperm.xlu0 %2124, %v920_v52  }
  0xa3   : > { %v430_v60 = vpop.permute.xlu1 %429  ;;  %v425_v61 = vpop.permute.xlu0 %424  ;;  %750 = vperm.xlu2 %2123, %v720_v56  }
  0xa4   : > { %v2459_v62 = vadd.f32 %v430_v60, %v405_v57  ;;  %v2461_v63 = vadd.f32 %v430_v60, %v406_v58  ;;  %v2463_v0 = vadd.f32 %v425_v61, %v403_v53  ;;  %v2465_v1 = vadd.f32 %v425_v61, %v404_v54 }
  0xa5   : > { %745 = vperm.xlu1 %2125, %v719_v59   ;;  %v573_v17 = vpop.permute.xlu2 %572  ;;  %v2544_v57 = vperm.slane %v645_v42, 3  ;;  %v2546_v58 = vperm.slane %v646_v43, 3  ;;  %v415_v59 = vmul.f32 %v2405_v29, %v2441_v50  ;;  %v416_v60 = vmul.f32 %v2407_v30, %v2441_v50  ;;  %v938_v50 = vld [vmem:[%s3124_s6 + $0xe0] sm:$0xff]  ;;  %v941_v42 = vld [vmem:[%s3124_s6 + $0xf8] sm:$0xff] }
  0xa6   : > { %1009 = vperm.xlu0 %2124, %v923_v2  }
  0xab   : > { %v2476_v6 = vpop.permute.xlu1 %444  ;;  %v2478_v7 = vpop.permute.xlu0 %439  ;;  %944 = vperm.xlu2 %2123, %v910_v3  }
  0xad   : > { %760 = vperm.xlu1 %2125, %v722_v5   ;;  %v921_v5 = vld [vmem:[%s3124_s6 + $0x58] sm:$0xff] }
  0xae   : > { %1024 = vperm.xlu0 %2124, %v926_v8  }
  0xaf   : > { %v2515_v33 = vpop.permute.xlu2 %494 }
  0xb3   : > { %959 = vperm.xlu2 %2123, %v913_v11   ;;  %v455_v18 = vpop.permute.xlu0 %454 }
  0xb4   : > { %v475_v15 = vpop.permute.xlu1 %474  ;;  %v471_v8 = vadd.f32 %v455_v18, %v415_v59  ;;  %v472_v9 = vadd.f32 %v455_v18, %v416_v60  ;;  %v522_v59 = vmul.f32 %v2493_v14, %v2515_v33 }
  0xb5   : > { %954 = vperm.xlu1 %2125, %v912_v12   ;;  %v511_v19 = vmul.f32 %v2491_v13, %v475_v15  ;;  %v512_v20 = vmul.f32 %v2493_v14, %v475_v15 }
  0xb6   : > { %1039 = vperm.xlu0 %2124, %v929_v16   ;;  %v595_v16 = vmul.f32 %v2527_v40, %v573_v17 }
  0xb7   : > { %v2501_v21 = vadd.f32 %v511_v19, %v2416_v37  ;;  %v2504_v23 = vadd.f32 %v512_v20, %v2418_v38  ;;  %v413_v37 = vmul.f32 %v2405_v29, %v387_v51  ;;  %v414_v38 = vmul.f32 %v2407_v30, %v387_v51 }
  0xb8   : > { %v524_v51 = vmul.f32 %v2493_v14, %v499_v4  ;;  %v2540_v53 = vpop.permute.xlu2 %560  ;;  %v596_v19 = vmul.f32 %v2529_v41, %v573_v17  ;;  %v924_v17 = vld [vmem:[%s3124_s6 + $0x70] sm:$0xff] }
  0xb9   : > { %v469_v45 = vadd.f32 %v2449_v55, %v413_v37  ;;  %v470_v48 = vadd.f32 %v2449_v55, %v414_v38  ;;  %v922_v55 = vld [vmem:[%s3124_s6 + $0x60] sm:$0xff] }
  0xbb   : > { %974 = vperm.xlu2 %2123, %v916_v26   ;;  %v539_v3 = vadd.f32 %v523_v49, %v469_v45  ;;  %v540_v4 = vadd.f32 %v524_v51, %v470_v48 }
  0xbd   : > { %969 = vperm.xlu1 %2125, %v915_v27   ;;  %v639_v31 = vpop.permute.xlu0 %638 }
  0xbe   : > { %v569_v32 = vpop.permute.xlu1 %568  ;;  %1054 = vperm.xlu0 %2124, %v932_v28   ;;  %v663_v12 = vmul.f32 %v2544_v57, %v639_v31  ;;  %v664_v15 = vmul.f32 %v2546_v58, %v639_v31 }
  0xbf   : > { %v593_v25 = vmul.f32 %v2527_v40, %v569_v32  ;;  %v594_v56 = vmul.f32 %v2529_v41, %v569_v32  ;;  %v925_v32 = vld [vmem:[%s3124_s6 + $0x78] sm:$0xff] }
  0xc1   : > { %v609_v10 = vadd.f32 %v593_v25, %v539_v3  ;;  %v610_v11 = vadd.f32 %v594_v56, %v540_v4  ;;  %v2570_v31 = vpop.permute.xlu2 %482  ;;  %v928_v25 = vld [vmem:[%s3124_s6 + $0x90] sm:$0xff]  ;;  %v412_v56 = vmul.f32 %v2407_v30, %v2392_v24  ;;  %v410_v3 = vmul.f32 %v2407_v30, %v2381_v22 }
  0xc2   : > { %v1474_v30 = vld [vmem:[%s3125_s7 + $0x10] sm:$0xff] }
  0xc3   : > { %989 = vperm.xlu2 %2123, %v919_v36   ;;  %v679_v27 = vadd.f32 %v663_v12, %v609_v10  ;;  %v680_v28 = vadd.f32 %v664_v15, %v610_v11  ;;  %v589_v12 = vmul.f32 %v2527_v40, %v2540_v53 }
  0xc5   : > { %984 = vperm.xlu1 %2125, %v918_v39   ;;  %v695_v43 = vmax.f32 %v679_v27, 0.0  ;;  %v696_v45 = vmax.f32 %v680_v28, 0.0 }
  0xc6   : > { %v503_v52 = vpop.permute.xlu0 %502  ;;  %1069 = vperm.xlu0 %2124, %v935_v44  }
  0xc7   : > { %v491_v54 = vpop.permute.xlu1 %490  ;;  %v525_v61 = vmul.f32 %v2491_v13, %v503_v52  ;;  %v526_v2 = vmul.f32 %v2493_v14, %v503_v52  ;;  %v411_v52 = vmul.f32 %v2405_v29, %v2392_v24 }
  0xc8   : > { %v519_v4 = vmul.f32 %v2491_v13, %v491_v54  ;;  %v520_v24 = vmul.f32 %v2493_v14, %v491_v54 }
  0xc9   : > { %v541_v20 = vadd.f32 %v525_v61, %v471_v8  ;;  %v542_v26 = vadd.f32 %v526_v2, %v472_v9  ;;  %v409_v2 = vmul.f32 %v2405_v29, %v2381_v22  ;;  %v468_v8 = vadd.f32 %v2476_v6, %v412_v56 }
  0xca   : > { %v635_v60 = vpop.permute.xlu2 %634  ;;  %v466_v22 = vadd.f32 %v2478_v7, %v410_v3 }
  0xcb   : > { %1004 = vperm.xlu2 %2123, %v922_v55   ;;  %v611_v36 = vadd.f32 %v595_v16, %v541_v20  ;;  %v612_v37 = vadd.f32 %v596_v19, %v542_v26  ;;  %v521_v55 = vmul.f32 %v2491_v13, %v2515_v33  ;;  %v467_v33 = vadd.f32 %v2476_v6, %v411_v52  ;;  %v931_v26 = vld [vmem:[%s3124_s6 + $0xa8] sm:$0xff]  ;;  %v934_v52 = vld [vmem:[%s3124_s6 + $0xc0] sm:$0xff] }
  0xcc   : > { %v465_v29 = vadd.f32 %v2478_v7, %v409_v2  ;;  %v538_v11 = vadd.f32 %v522_v59, %v468_v8  ;;  %v590_v6 = vmul.f32 %v2529_v41, %v2540_v53  ;;  %v661_v16 = vmul.f32 %v2544_v57, %v635_v60  ;;  %v930_v53 = vld [vmem:[%s3124_s6 + $0xa0] sm:$0xff] }
  0xcd   : > { %999 = vperm.xlu1 %2125, %v921_v5   ;;  %v927_v5 = vld [vmem:[%s3124_s6 + $0x88] sm:$0xff]  ;;  %v537_v54 = vadd.f32 %v521_v55, %v467_v33  ;;  %v662_v7 = vmul.f32 %v2546_v58, %v635_v60 }
  0xce   : > { %1084 = vperm.xlu0 %2124, %v938_v50   ;;  %v535_v15 = vadd.f32 %v519_v4, %v465_v29  ;;  %v536_v50 = vadd.f32 %v520_v24, %v466_v22  ;;  %v515_v4 = vmul.f32 %v2491_v13, %v2570_v31  ;;  %v516_v24 = vmul.f32 %v2493_v14, %v2570_v31  ;;  %v937_v22 = vld [vmem:[%s3124_s6 + $0xd8] sm:$0xff] }
  0xd0   : > { %v643_v18 = vpop.permute.xlu1 %642  ;;  %v605_v27 = vadd.f32 %v589_v12, %v535_v15  ;;  %v606_v28 = vadd.f32 %v590_v6, %v536_v50  ;;  %v532_v31 = vadd.f32 %v516_v24, %v2461_v63 }
  0xd1   : > { %v665_v34 = vmul.f32 %v2544_v57, %v643_v18  ;;  %v666_v35 = vmul.f32 %v2546_v58, %v643_v18 }
  0xd3   : > { %v681_v38 = vadd.f32 %v665_v34, %v611_v36  ;;  %v682_v39 = vadd.f32 %v666_v35, %v612_v37  ;;  %1019 = vperm.xlu2 %2123, %v925_v32   ;;  %v557_v32 = vpop.permute.xlu2 %556 }
  0xd4   : > { %v587_v2 = vmul.f32 %v2527_v40, %v557_v32  ;;  %v588_v3 = vmul.f32 %v2529_v41, %v557_v32  ;;  %v939_v32 = vld [vmem:[%s3124_s6 + $0xe8] sm:$0xff] }
  0xd5   : > { %1014 = vperm.xlu1 %2125, %v924_v17   ;;  %v697_v44 = vmax.f32 %v681_v38, 0.0  ;;  %v698_v48 = vmax.f32 %v682_v39, 0.0  ;;  %v1477_v39 = vld [vmem:[%s3125_s7 + $0x28] sm:$0xff] }
  0xd6   : > { %1099 = vperm.xlu0 %2124, %v941_v42  }
  0xd7   : > { %v713_v49 = vpack.c.bf16 %v697_v44, %v695_v43  ;;  %v714_v51 = vpack.c.bf16 %v698_v48, %v696_v45  ;;  %v487_v48 = vpop.permute.xlu0 %486 }
  0xd8   : > { %v517_v55 = vmul.f32 %v2491_v13, %v487_v48  ;;  %v518_v59 = vmul.f32 %v2493_v14, %v487_v48 }
  0xd9   : > { %v565_v61 = vpop.permute.xlu1 %564  ;;  %800 = vmatpush.bf16.msra.mxu0 %v713_v49  ;;  %829 = vmatpush.bf16.msra.mxu1 %v714_v51 }
  0xda   : > { %v591_v9 = vmul.f32 %v2527_v40, %v565_v61  ;;  %v592_v10 = vmul.f32 %v2529_v41, %v565_v61  ;;  %v1480_v61 = vld [vmem:[%s3125_s7 + $0x40] sm:$0xff]  ;;  %v534_v33 = vadd.f32 %v518_v59, %v2433_v47  ;;  %v531_v47 = vadd.f32 %v515_v4, %v2459_v62  ;;  %v1489_v59 = vld [vmem:[%s3125_s7 + $0x88] sm:$0xff] }
  0xdb   : > { %1034 = vperm.xlu2 %2123, %v928_v25   ;;  %v933_v25 = vld [vmem:[%s3124_s6 + $0xb8] sm:$0xff] }
  0xdc   : > { %v607_v19 = vadd.f32 %v591_v9, %v537_v54  ;;  %v608_v20 = vadd.f32 %v592_v10, %v538_v11  ;;  %v627_v60 = vpop.permute.xlu2 %626  ;;  %v604_v54 = vadd.f32 %v588_v3, %v534_v33 }
  0xdd   : > { %1029 = vperm.xlu1 %2125, %v927_v5   ;;  %v533_v5 = vadd.f32 %v517_v55, %v2431_v46  ;;  %v657_v8 = vmul.f32 %v2544_v57, %v627_v60  ;;  %v658_v9 = vmul.f32 %v2546_v58, %v627_v60  ;;  %v936_v46 = vld [vmem:[%s3124_s6 + $0xd0] sm:$0xff] }
  0xde   : > { %1516 = vperm.xlu0 %2124, %v1474_v30   ;;  %v677_v36 = vadd.f32 %v661_v16, %v607_v19  ;;  %v678_v37 = vadd.f32 %v662_v7, %v608_v20  ;;  %v1483_v20 = vld [vmem:[%s3125_s7 + $0x58] sm:$0xff] }
  0xdf   : > { %v603_v30 = vadd.f32 %v587_v2, %v533_v5  ;;  %v479_v11 = vpop.permute.xlu0 %478  ;;  %v674_v6 = vadd.f32 %v658_v9, %v604_v54  ;;  %v1482_v54 = vld [vmem:[%s3125_s7 + $0x50] sm:$0xff] }
  0xe0   : > { %v693_v43 = vmax.f32 %v677_v36, 0.0  ;;  %v694_v45 = vmax.f32 %v678_v37, 0.0 }
  0xe1   : > { %v673_v12 = vadd.f32 %v657_v8, %v603_v30  ;;  %v1495_v30 = vld [vmem:[%s3125_s7 + $0xb8] sm:$0xff] }
  0xe2   : > { %v631_v18 = vpop.permute.xlu1 %630 }
  0xe3   : > { %v659_v34 = vmul.f32 %v2544_v57, %v631_v18  ;;  %v660_v35 = vmul.f32 %v2546_v58, %v631_v18  ;;  %1049 = vperm.xlu2 %2123, %v931_v26   ;;  %v689_v18 = vmax.f32 %v673_v12, 0.0  ;;  %v1484_v12 = vld [vmem:[%s3125_s7 + $0x60] sm:$0xff] }
  0xe5   : > { %v675_v17 = vadd.f32 %v659_v34, %v605_v27  ;;  %v676_v38 = vadd.f32 %v660_v35, %v606_v28  ;;  %1044 = vperm.xlu1 %2125, %v930_v53   ;;  %v690_v28 = vmax.f32 %v674_v6, 0.0  ;;  %v940_v53 = vld [vmem:[%s3124_s6 + $0xf0] sm:$0xff]  ;;  %v1501_v6 = vld [vmem:[%s3125_s7 + $0xe8] sm:$0xff] }
  0xe6   : > { %1531 = vperm.xlu0 %2124, %v1477_v39  }
  0xe7   : > { %v691_v42 = vmax.f32 %v675_v17, 0.0  ;;  %v692_v44 = vmax.f32 %v676_v38, 0.0  ;;  %v545_v36 = vpop.permute.xlu0 %544  ;;  %v1486_v17 = vld [vmem:[%s3125_s7 + $0x70] sm:$0xff]  ;;  %v615_v38 = vpop.permute.xlu2 %614 }
  0xe8   : > { %v581_v39 = vmul.f32 %v2527_v40, %v545_v36  ;;  %v651_v48 = vmul.f32 %v2544_v57, %v615_v38 }
  0xe9   : > { %v711_v49 = vpack.c.bf16 %v693_v43, %v691_v42  ;;  %v712_v51 = vpack.c.bf16 %v694_v45, %v692_v44  ;;  %v582_v42 = vmul.f32 %v2529_v41, %v545_v36  ;;  %v513_v43 = vmul.f32 %v2491_v13, %v479_v11  ;;  %v1473_v45 = vld [vmem:[%s3125_s7 + $0x8] sm:$0xff] }
  0xea   : > { %v514_v44 = vmul.f32 %v2493_v14, %v479_v11  ;;  %v597_v13 = vadd.f32 %v581_v39, %v2501_v21  ;;  %v1485_v11 = vld [vmem:[%s3125_s7 + $0x68] sm:$0xff] }
  0xeb   : > { %v553_v56 = vpop.permute.xlu1 %552  ;;  %801 = vmatpush.bf16.msra.mxu0 %v711_v49  ;;  %830 = vmatpush.bf16.msra.mxu1 %v712_v51  ;;  %v652_v49 = vmul.f32 %v2546_v58, %v615_v38  ;;  %v1472_v51 = vld [vmem:[%s3125_s7] sm:$0xff]  ;;  %v598_v14 = vadd.f32 %v582_v42, %v2504_v23 }
  0xec   : > { %1064 = vperm.xlu2 %2123, %v934_v52   ;;  %v585_v10 = vmul.f32 %v2527_v40, %v553_v56  ;;  %v586_v29 = vmul.f32 %v2529_v41, %v553_v56  ;;  %v529_v56 = vadd.f32 %v513_v43, %v2463_v0  ;;  %v530_v55 = vadd.f32 %v514_v44, %v2465_v1  ;;  %v1476_v0 = vld [vmem:[%s3125_s7 + $0x20] sm:$0xff]  ;;  %v1475_v1 = vld [vmem:[%s3125_s7 + $0x18] sm:$0xff] }
  0xed   : > { %1059 = vperm.xlu1 %2125, %v933_v25   ;;  %v667_v60 = vadd.f32 %v651_v48, %v597_v13 }
  0xee   : > { %1546 = vperm.xlu0 %2124, %v1480_v61   ;;  %v601_v50 = vadd.f32 %v585_v10, %v531_v47  ;;  %v602_v16 = vadd.f32 %v586_v29, %v532_v31  ;;  %v668_v61 = vadd.f32 %v652_v49, %v598_v14  ;;  %v2028_v10 = vld [vmem:[%s3121_s3] sm:$0xff]  ;;  %v1479_v29 = vld [vmem:[%s3125_s7 + $0x38] sm:$0xff]  ;;  %v1498_v47 = vld [vmem:[%s3125_s7 + $0xd0] sm:$0xff] }
  0xef   : > { %v683_v24 = vmax.f32 %v667_v60, 0.0  ;;  %v2029_v31 = vld [vmem:[%s3121_s3 + $0x8] sm:$0xff]  ;;  %v726_v48 = vpop.permute.xlu2 %725 }
  0xf0   : > { %v684_v33 = vmax.f32 %v668_v61, 0.0 }
  0xf4   : > { %v623_v15 = vpop.permute.xlu1 %622  ;;  %1079 = vperm.xlu2 %2123, %v937_v22   ;;  %v1478_v22 = vld [vmem:[%s3125_s7 + $0x30] sm:$0xff] }
  0xf5   : > { %v655_v7 = vmul.f32 %v2544_v57, %v623_v15  ;;  %v656_v19 = vmul.f32 %v2546_v58, %v623_v15  ;;  %1074 = vperm.xlu1 %2125, %v936_v46   ;;  %v1481_v46 = vld [vmem:[%s3125_s7 + $0x48] sm:$0xff]  ;;  %v1488_v15 = vld [vmem:[%s3125_s7 + $0x80] sm:$0xff] }
  0xf6   : > { %1561 = vperm.xlu0 %2124, %v1483_v20   ;;  %v1490_v20 = vld [vmem:[%s3125_s7 + $0x90] sm:$0xff] }
  0xf7   : > { %v671_v62 = vadd.f32 %v655_v7, %v601_v50  ;;  %v672_v26 = vadd.f32 %v656_v19, %v602_v16  ;;  %v1487_v50 = vld [vmem:[%s3125_s7 + $0x78] sm:$0xff]  ;;  %v1802_v16 = vld [vmem:[#allocation2] sm:$0x1]  ;;  %v2030_v7 = vld [vmem:[%s3121_s3 + $0x10] sm:$0xff]  ;;  %v741_v13 = vpop.permute.xlu2 %740 }
  0xf8   : > { %v1491_v19 = vld [vmem:[%s3125_s7 + $0x98] sm:$0xff] }
  0xf9   : > { %v687_v63 = vmax.f32 %v671_v62, 0.0  ;;  %v688_v27 = vmax.f32 %v672_v26, 0.0  ;;  %v1494_v62 = vld [vmem:[%s3125_s7 + $0xb0] sm:$0xff]  ;;  %v1493_v26 = vld [vmem:[%s3125_s7 + $0xa8] sm:$0xff] }
  0xfb   : > { %v709_v34 = vpack.c.bf16 %v689_v18, %v687_v63  ;;  %v710_v35 = vpack.c.bf16 %v690_v28, %v688_v27  ;;  %v2031_v63 = vld [vmem:[%s3121_s3 + $0x18] sm:$0xff]  ;;  %v1497_v18 = vld [vmem:[%s3125_s7 + $0xc8] sm:$0xff]  ;;  %v1496_v27 = vld [vmem:[%s3125_s7 + $0xc0] sm:$0xff] }
  0xfc   : > { %1094 = vperm.xlu2 %2123, %v940_v53   ;;  %v1500_v28 = vld [vmem:[%s3125_s7 + $0xe0] sm:$0xff]  ;;  %v1499_v53 = vld [vmem:[%s3125_s7 + $0xd8] sm:$0xff] }
  0xfd   : > { %1089 = vperm.xlu1 %2125, %v939_v32   ;;  %v549_v37 = vpop.permute.xlu1 %548  ;;  %802 = vmatpush.bf16.msra.mxu0 %v709_v34  ;;  %v1503_v32 = vld [vmem:[%s3125_s7 + $0xf8] sm:$0xff]  ;;  %v1502_v34 = vld [vmem:[%s3125_s7 + $0xf0] sm:$0xff] }
  0xfe   : > { %831 = vmatpush.bf16.msra.mxu1 %v710_v35  ;;  %1576 = vperm.xlu0 %2124, %v1486_v17   ;;  %v583_v52 = vmul.f32 %v2527_v40, %v549_v37  ;;  %v584_v25 = vmul.f32 %v2529_v41, %v549_v37 }
  0xff   : > { %v751_v60 = vpop.permute.xlu2 %750 }
 0x100   : > { %v599_v40 = vadd.f32 %v583_v52, %v529_v56  ;;  %v600_v41 = vadd.f32 %v584_v25, %v530_v55  ;;  %v731_v25 = vpop.permute.xlu0 %730 }
 0x104   : > { %1511 = vperm.xlu2 %2123, %v1473_v45  }
 0x105   : > { %1506 = vperm.xlu1 %2125, %v1472_v51  }
 0x106   : > { %v619_v2 = vpop.permute.xlu1 %618  ;;  %1591 = vperm.xlu0 %2124, %v1489_v59  }
 0x107   : > { %v653_v21 = vmul.f32 %v2544_v57, %v619_v2  ;;  %v654_v23 = vmul.f32 %v2546_v58, %v619_v2  ;;  %v1492_v58 = vld [vmem:[%s3125_s7 + $0xa0] sm:$0xff] }
 0x108   : > { %v756_v59 = vpop.permute.xlu0 %755 }
 0x109   : > { %v669_v3 = vadd.f32 %v653_v21, %v599_v40  ;;  %v670_v4 = vadd.f32 %v654_v23, %v600_v41 }
 0x10b   : > { %v685_v5 = vmax.f32 %v669_v3, 0.0  ;;  %v686_v8 = vmax.f32 %v670_v4, 0.0 }
 0x10c   : > { %1526 = vperm.xlu2 %2123, %v1476_v0  }
 0x10d   : > { %1521 = vperm.xlu1 %2125, %v1475_v1   ;;  %v707_v9 = vpack.c.bf16 %v685_v5, %v683_v24  ;;  %v708_v57 = vpack.c.bf16 %v686_v8, %v684_v33 }
 0x10e   : > { %1606 = vperm.xlu0 %2124, %v1492_v58  }
 0x10f   : > { %803 = vmatpush.bf16.msra.mxu0 %v707_v9  ;;  %832 = vmatpush.bf16.msra.mxu1 %v708_v57  ;;  %v736_v49 = vpop.permute.xlu1 %735 }
 0x112   : > { %1920 = vmatmul.msk.bf16.vlgmr.msra.gmra.mxu0 %vm783_vm0, %v2028_v10  ;;  %1924 = vmatmul.msk.bf16.vlgmr.msra.gmra.mxu1 %vm783_vm0, %v2028_v10 }
 0x114   : > { %1541 = vperm.xlu2 %2123, %v1479_v29  }
 0x115   : > { %1536 = vperm.xlu1 %2125, %v1478_v22  }
 0x116   : > { %1621 = vperm.xlu0 %2124, %v1495_v30  }
 0x117   : > { %v746_v14 = vpop.permute.xlu1 %745 }
 0x11c   : > { %1556 = vperm.xlu2 %2123, %v1482_v54  }
 0x11d   : > { %1551 = vperm.xlu1 %2125, %v1481_v46  }
 0x11e   : > { %1636 = vperm.xlu0 %2124, %v1498_v47  }
 0x11f   : > { %v761_v2 = vpop.permute.xlu1 %760 }
 0x122   : > { %1921 = vmatmul.msk.bf16.gmra.mxu0 %vm783_vm0, %v2029_v31  ;;  %1925 = vmatmul.msk.bf16.gmra.mxu1 %vm783_vm0, %v2029_v31 }
 0x124   : > { %1571 = vperm.xlu2 %2123, %v1485_v11  }
 0x125   : > { %1566 = vperm.xlu1 %2125, %v1484_v12  }
 0x126   : > { %1651 = vperm.xlu0 %2124, %v1501_v6  }
 0x12c   : > { %1586 = vperm.xlu2 %2123, %v1488_v15  }
 0x12d   : > { %1581 = vperm.xlu1 %2125, %v1487_v50  }
 0x12e   : > { %1805 = vperm.xlu0 %2124, %v1802_v16  }
 0x132   : > { %1922 = vmatmul.msk.bf16.gmra.mxu0 %vm783_vm0, %v2030_v7  ;;  %1926 = vmatmul.msk.bf16.gmra.mxu1 %vm783_vm0, %v2030_v7 }
 0x134   : > { %1601 = vperm.xlu2 %2123, %v1491_v19  }
 0x135   : > { %1596 = vperm.xlu1 %2125, %v1490_v20  }
 0x13c   : > { %1616 = vperm.xlu2 %2123, %v1494_v62  }
 0x13d   : > { %1611 = vperm.xlu1 %2125, %v1493_v26  }
 0x142   : > { %1923 = vmatmul.msk.bf16.gmra.mxu0 %vm783_vm0, %v2031_v63  ;;  %1927 = vmatmul.msk.bf16.gmra.mxu1 %vm783_vm0, %v2031_v63 }
 0x144   : > { %1631 = vperm.xlu2 %2123, %v1497_v18  }
 0x145   : > { %1626 = vperm.xlu1 %2125, %v1496_v27  }
 0x14c   : > { %1646 = vperm.xlu2 %2123, %v1500_v28  }
 0x14d   : > { %1641 = vperm.xlu1 %2125, %v1499_v53  }
 0x154   : > { %1661 = vperm.xlu2 %2123, %v1503_v32  }
 0x155   : > { %1656 = vperm.xlu1 %2125, %v1502_v34  }
 0x18f   : > { %v805_v35 = vpop.f32.mrf.mxu0  ;;  %v834_v36 = vpop.f32.mrf.mxu1 }
 0x190   : > { %v806_v7 = vadd.f32 %v805_v35, %v726_v48  ;;  %v835_v20 = vadd.f32 %v834_v36, %v726_v48  ;;  %v2032_v35 = vld [vmem:[%s3123_s5] sm:$0xff]  ;;  %v2038_v36 = vld [vmem:[%s3123_s5 + $0x30] sm:$0xff]  ;;  %v2832_v48 = vpop.permute.xlu2 %944 }
 0x192   : > { %v854_v28 = vmax.f32 %v806_v7, 0.0  ;;  %v855_v53 = vmax.f32 %v835_v20, 0.0 }
 0x197   : > { %v807_v37 = vpop.f32.mrf.mxu0  ;;  %v836_v17 = vpop.f32.mrf.mxu1 }
 0x198   : > { %v808_v11 = vadd.f32 %v807_v37, %v731_v25  ;;  %v837_v15 = vadd.f32 %v836_v17, %v731_v25  ;;  %v2033_v37 = vld [vmem:[%s3123_s5 + $0x8] sm:$0xff]  ;;  %v2039_v17 = vld [vmem:[%s3123_s5 + $0x38] sm:$0xff] }
 0x19a   : > { %v856_v26 = vmax.f32 %v808_v11, 0.0  ;;  %v857_v18 = vmax.f32 %v837_v15, 0.0  ;;  %v2047_v11 = vld [vmem:[%s3123_s5 + $0x78] sm:$0xff] }
 0x19c   : > { %v902_v32 = vpack.c.bf16 %v856_v26, %v854_v28  ;;  %v903_v34 = vpack.c.bf16 %v857_v18, %v855_v53 }
 0x19f   : > { %v810_v38 = vpop.f32.mrf.mxu0  ;;  %v839_v39 = vpop.f32.mrf.mxu1 }
 0x1a0   : > { %v811_v54 = vadd.f32 %v810_v38, %v736_v49  ;;  %v840_v47 = vadd.f32 %v839_v39, %v736_v49  ;;  %v2034_v38 = vld [vmem:[%s3123_s5 + $0x10] sm:$0xff]  ;;  %v2040_v39 = vld [vmem:[%s3123_s5 + $0x40] sm:$0xff]  ;;  %v2836_v49 = vpop.permute.xlu0 %949 }
 0x1a2   : > { %v858_v19 = vmax.f32 %v811_v54, 0.0  ;;  %v859_v62 = vmax.f32 %v840_v47, 0.0 }
 0x1a7   : > { %v812_v42 = vpop.f32.mrf.mxu0  ;;  %v841_v43 = vpop.f32.mrf.mxu1 }
 0x1a8   : > { %v813_v57 = vadd.f32 %v812_v42, %v741_v13  ;;  %v842_v29 = vadd.f32 %v841_v43, %v741_v13  ;;  %v2035_v42 = vld [vmem:[%s3123_s5 + $0x18] sm:$0xff]  ;;  %v2041_v43 = vld [vmem:[%s3123_s5 + $0x48] sm:$0xff]  ;;  %v2844_v25 = vpop.permute.xlu0 %964 }
 0x1a9   : > { %v2037_v13 = vld [vmem:[%s3123_s5 + $0x28] sm:$0xff] }
 0x1aa   : > { %v860_v12 = vmax.f32 %v813_v57, 0.0  ;;  %v861_v50 = vmax.f32 %v842_v29, 0.0 }
 0x1ac   : > { %v904_v63 = vpack.c.bf16 %v860_v12, %v858_v19  ;;  %v905_v27 = vpack.c.bf16 %v861_v50, %v859_v62 }
 0x1af   : > { %v815_v44 = vpop.f32.mrf.mxu0  ;;  %v844_v45 = vpop.f32.mrf.mxu1 }
 0x1b0   : > { %v816_v1 = vadd.f32 %v815_v44, %v746_v14  ;;  %v845_v33 = vadd.f32 %v844_v45, %v746_v14  ;;  %v2036_v44 = vld [vmem:[%s3123_s5 + $0x20] sm:$0xff]  ;;  %v2042_v45 = vld [vmem:[%s3123_s5 + $0x50] sm:$0xff]  ;;  %v2043_v14 = vld [vmem:[%s3123_s5 + $0x58] sm:$0xff] }
 0x1b2   : > { %v862_v46 = vmax.f32 %v816_v1, 0.0  ;;  %v863_v31 = vmax.f32 %v845_v33, 0.0  ;;  %v2046_v33 = vld [vmem:[%s3123_s5 + $0x70] sm:$0xff] }
 0x1b7   : > { %v817_v51 = vpop.f32.mrf.mxu0  ;;  %v846_v52 = vpop.f32.mrf.mxu1 }
 0x1b8   : > { %v818_v21 = vadd.f32 %v817_v51, %v751_v60  ;;  %v847_v4 = vadd.f32 %v846_v52, %v751_v60  ;;  %v2840_v51 = vpop.permute.xlu1 %954  ;;  %v2842_v52 = vpop.permute.xlu2 %959 }
 0x1ba   : > { %v864_v58 = vmax.f32 %v818_v21, 0.0  ;;  %v865_v22 = vmax.f32 %v847_v4, 0.0 }
 0x1bc   : > { %v906_v6 = vpack.c.bf16 %v864_v58, %v862_v46  ;;  %v907_v16 = vpack.c.bf16 %v865_v22, %v863_v31 }
 0x1bf   : > { %v820_v56 = vpop.f32.mrf.mxu0  ;;  %v849_v55 = vpop.f32.mrf.mxu1 }
 0x1c0   : > { %v821_v61 = vadd.f32 %v820_v56, %v756_v59  ;;  %v850_v40 = vadd.f32 %v849_v55, %v756_v59  ;;  %v2854_v56 = vpop.permute.xlu1 %969  ;;  %v2858_v55 = vpop.permute.xlu2 %974 }
 0x1c1   : > { %v2860_v59 = vpop.permute.xlu0 %979 }
 0x1c2   : > { %v866_v24 = vmax.f32 %v821_v61, 0.0  ;;  %v867_v8 = vmax.f32 %v850_v40, 0.0  ;;  %v2044_v61 = vld [vmem:[%s3123_s5 + $0x60] sm:$0xff] }
 0x1c7   : > { %v822_v41 = vpop.f32.mrf.mxu0  ;;  %v851_v3 = vpop.f32.mrf.mxu1 }
 0x1c8   : > { %v823_v23 = vadd.f32 %v822_v41, %v761_v2  ;;  %v852_v0 = vadd.f32 %v851_v3, %v761_v2  ;;  %v2862_v60 = vpop.permute.xlu1 %984  ;;  %v2867_v2 = vpop.permute.xlu2 %989  ;;  %v2045_v3 = vld [vmem:[%s3123_s5 + $0x68] sm:$0xff] }
 0x1c9   : > { %v2869_v40 = vpop.permute.xlu0 %994 }
 0x1ca   : > { %v868_v5 = vmax.f32 %v823_v23, 0.0  ;;  %v869_v9 = vmax.f32 %v852_v0, 0.0 }
 0x1cc   : > { %v908_v10 = vpack.c.bf16 %v868_v5, %v866_v24  ;;  %v909_v30 = vpack.c.bf16 %v869_v9, %v867_v8 }
 0x1ce   : > { %1234 = vmatpush.bf16.msrb.mxu0 %v908_v10  ;;  %2048 = vmatpush.bf16.msra.mxu2 %v908_v10 }
 0x1cf   : > { %1323 = vmatpush.bf16.msrb.mxu1 %v909_v30  ;;  %2052 = vmatpush.bf16.msra.mxu3 %v909_v30 }
 0x1d0   : > { %v2873_v41 = vpop.permute.xlu1 %999  ;;  %v2875_v21 = vpop.permute.xlu2 %1004 }
 0x1d1   : > { %v2877_v23 = vpop.permute.xlu0 %1009 }
 0x1d2   : > { %1235 = vmatpush.bf16.msrb.mxu0 %v906_v6  ;;  %2049 = vmatpush.bf16.msra.mxu2 %v906_v6 }
 0x1d3   : > { %1324 = vmatpush.bf16.msrb.mxu1 %v907_v16  ;;  %2053 = vmatpush.bf16.msra.mxu3 %v907_v16 }
 0x1d6   : > { %1236 = vmatpush.bf16.msrb.mxu0 %v904_v63  ;;  %2050 = vmatpush.bf16.msra.mxu2 %v904_v63 }
 0x1d7   : > { %1325 = vmatpush.bf16.msrb.mxu1 %v905_v27  ;;  %2054 = vmatpush.bf16.msra.mxu3 %v905_v27 }
 0x1d8   : > { %v2882_v4 = vpop.permute.xlu1 %1014  ;;  %v2885_v0 = vpop.permute.xlu2 %1019 }
 0x1d9   : > { %v2888_v1 = vpop.permute.xlu0 %1024 }
 0x1da   : > { %1237 = vmatpush.bf16.msrb.mxu0 %v902_v32  ;;  %2051 = vmatpush.bf16.msra.mxu2 %v902_v32 }
 0x1db   : > { %1326 = vmatpush.bf16.msrb.mxu1 %v903_v34  ;;  %2055 = vmatpush.bf16.msra.mxu3 %v903_v34 }
 0x1dd   : > { %1992 = vmatmul.msk.bf16.vlgmr.msrb.gmra.mxu0 %vm783_vm0, %v2032_v35  ;;  %1998 = vmatmul.msk.bf16.vlgmr.msra.gmra.mxu2 %vm783_vm0, %v2038_v36 }
 0x1de   : > { %2008 = vmatmul.msk.bf16.vlgmr.msrb.gmra.mxu1 %vm783_vm0, %v2032_v35  ;;  %2014 = vmatmul.msk.bf16.vlgmr.msra.gmra.mxu3 %vm783_vm0, %v2038_v36 }
 0x1e0   : > { %v2890_v24 = vpop.permute.xlu1 %1029  ;;  %v2892_v5 = vpop.permute.xlu2 %1034 }
 0x1e1   : > { %3145 = vst [vmem:[#allocation6_spill] sm:$0xff] %v2890_v24  ;;  %v2897_v8 = vpop.permute.xlu0 %1039 }
 0x1e2   : > { %3146 = vst [vmem:[#allocation7_spill] sm:$0xff] %v2892_v5 }
 0x1e3   : > { %3147 = vst [vmem:[#allocation8_spill] sm:$0xff] %v2897_v8 }
 0x1e8   : > { %v2901_v58 = vpop.permute.xlu1 %1044  ;;  %v2907_v22 = vpop.permute.xlu2 %1049 }
 0x1e9   : > { %3148 = vst [vmem:[#allocation9_spill] sm:$0xff] %v2901_v58  ;;  %v2909_v46 = vpop.permute.xlu0 %1054 }
 0x1ea   : > { %3149 = vst [vmem:[#allocation10_spill] sm:$0xff] %v2907_v22 }
 0x1eb   : > { %3150 = vst [vmem:[#allocation11_spill] sm:$0xff] %v2909_v46 }
 0x1ed   : > { %1993 = vmatmul.msk.bf16.gmra.mxu0 %vm783_vm0, %v2033_v37  ;;  %1999 = vmatmul.msk.bf16.gmra.mxu2 %vm783_vm0, %v2039_v17 }
 0x1ee   : > { %2009 = vmatmul.msk.bf16.gmra.mxu1 %vm783_vm0, %v2033_v37  ;;  %2015 = vmatmul.msk.bf16.gmra.mxu3 %vm783_vm0, %v2039_v17 }
 0x1f0   : > { %v2918_v12 = vpop.permute.xlu1 %1059  ;;  %v2920_v50 = vpop.permute.xlu2 %1064 }
 0x1f1   : > { %3151 = vst [vmem:[#allocation12_spill] sm:$0xff] %v2918_v12  ;;  %v2923_v16 = vpop.permute.xlu0 %1069 }
 0x1f2   : > { %3152 = vst [vmem:[#allocation13_spill] sm:$0xff] %v2920_v50 }
 0x1f3   : > { %3153 = vst [vmem:[#allocation14_spill] sm:$0xff] %v2923_v16 }
 0x1f8   : > { %v2930_v26 = vpop.permute.xlu1 %1074  ;;  %v2932_v63 = vpop.permute.xlu2 %1079 }
 0x1f9   : > { %3154 = vst [vmem:[#allocation15_spill] sm:$0xff] %v2930_v26  ;;  %v2934_v18 = vpop.permute.xlu0 %1084 }
 0x1fa   : > { %3155 = vst [vmem:[#allocation16_spill] sm:$0xff] %v2932_v63 }
 0x1fb   : > { %3156 = vst [vmem:[#allocation17_spill] sm:$0xff] %v2934_v18 }
 0x1fd   : > { %1994 = vmatmul.msk.bf16.gmra.mxu0 %vm783_vm0, %v2034_v38  ;;  %2000 = vmatmul.msk.bf16.gmra.mxu2 %vm783_vm0, %v2040_v39 }
 0x1fe   : > { %2010 = vmatmul.msk.bf16.gmra.mxu1 %vm783_vm0, %v2034_v38  ;;  %2016 = vmatmul.msk.bf16.gmra.mxu3 %vm783_vm0, %v2040_v39 }
 0x200   : > { %v2940_v34 = vpop.permute.xlu1 %1089  ;;  %v2942_v35 = vpop.permute.xlu2 %1094 }
 0x201   : > { %3157 = vst [vmem:[#allocation18_spill] sm:$0xff] %v2940_v34  ;;  %v2948_v17 = vpop.permute.xlu0 %1099 }
 0x202   : > { %3158 = vst [vmem:[#allocation19_spill] sm:$0xff] %v2942_v35 }
 0x203   : > { %3161 = vst [vmem:[#allocation22_spill] sm:$0xff] %v2948_v17 }
 0x20d   : > { %1995 = vmatmul.msk.bf16.gmra.mxu0 %vm783_vm0, %v2035_v42  ;;  %2001 = vmatmul.msk.bf16.gmra.mxu2 %vm783_vm0, %v2041_v43 }
 0x20e   : > { %2011 = vmatmul.msk.bf16.gmra.mxu1 %vm783_vm0, %v2035_v42  ;;  %2017 = vmatmul.msk.bf16.gmra.mxu3 %vm783_vm0, %v2041_v43  ;;  %v1507_v42 = vpop.permute.xlu1 %1506 }
 0x21d   : > { %1996 = vmatmul.msk.bf16.gmra.mxu0 %vm783_vm0, %v2036_v44  ;;  %2002 = vmatmul.msk.bf16.gmra.mxu2 %vm783_vm0, %v2042_v45 }
 0x21e   : > { %2012 = vmatmul.msk.bf16.gmra.mxu1 %vm783_vm0, %v2036_v44  ;;  %2018 = vmatmul.msk.bf16.gmra.mxu3 %vm783_vm0, %v2042_v45  ;;  %v1512_v45 = vpop.permute.xlu2 %1511 }
 0x226   : > { %v1527_v18 = vpop.permute.xlu2 %1526 }
 0x22d   : > { %1997 = vmatmul.msk.bf16.gmra.mxu0 %vm783_vm0, %v2037_v13  ;;  %2003 = vmatmul.msk.bf16.gmra.mxu2 %vm783_vm0, %v2043_v14 }
 0x22e   : > { %2013 = vmatmul.msk.bf16.gmra.mxu1 %vm783_vm0, %v2037_v13  ;;  %2019 = vmatmul.msk.bf16.gmra.mxu3 %vm783_vm0, %v2043_v14 }
 0x23d   : > { %2004 = vmatmul.msk.bf16.gmra.mxu2 %vm783_vm0, %v2044_v61 }
 0x23e   : > { %2020 = vmatmul.msk.bf16.gmra.mxu3 %vm783_vm0, %v2044_v61  ;;  %v1517_v61 = vpop.permute.xlu0 %1516 }
 0x246   : > { %v2958_v17 = vpop.permute.xlu0 %1531 }
 0x24d   : > { %2005 = vmatmul.msk.bf16.gmra.mxu2 %vm783_vm0, %v2045_v3 }
 0x24e   : > { %2021 = vmatmul.msk.bf16.gmra.mxu3 %vm783_vm0, %v2045_v3 }
 0x25a   : > { %v1239_v9 = vpop.f32.mrf.mxu0 }
 0x25b   : > { %v1328_v57 = vpop.f32.mrf.mxu1  ;;  %v1240_v46 = vadd.f32 %v1239_v9, %v2832_v48 }
 0x25d   : > { %2006 = vmatmul.msk.bf16.gmra.mxu2 %vm783_vm0, %v2046_v33 }
 0x25e   : > { %2022 = vmatmul.msk.bf16.gmra.mxu3 %vm783_vm0, %v2046_v33 }
 0x260   : > { %v2903_v10 = vpop.f32.mrf.mxu2 }
 0x261   : > { %v2905_v29 = vpop.f32.mrf.mxu3 }
 0x262   : > { %v1241_v30 = vpop.f32.mrf.mxu0 }
 0x263   : > { %v1330_v54 = vpop.f32.mrf.mxu1  ;;  %v1242_v26 = vadd.f32 %v1241_v30, %v2836_v49  ;;  %v2973_v30 = vpop.permute.xlu2 %1541 }
 0x264   : > { %v1331_v50 = vadd.f32 %v1330_v54, %v2836_v49  ;;  %v1408_v54 = vmax.f32 %v1240_v46, 0.0 }
 0x265   : > { %v1410_v5 = vmax.f32 %v1242_v26, 0.0 }
 0x268   : > { %v2911_v47 = vpop.f32.mrf.mxu2 }
 0x269   : > { %v2913_v31 = vpop.f32.mrf.mxu3 }
 0x26a   : > { %v1244_v6 = vpop.f32.mrf.mxu0 }
 0x26b   : > { %v1333_v15 = vpop.f32.mrf.mxu1  ;;  %v1245_v22 = vadd.f32 %v1244_v6, %v2840_v51  ;;  %v2977_v6 = vpop.permute.xlu0 %1546 }
 0x26d   : > { %2007 = vmatmul.msk.bf16.gmra.mxu2 %vm783_vm0, %v2047_v11 }
 0x26e   : > { %2023 = vmatmul.msk.bf16.gmra.mxu3 %vm783_vm0, %v2047_v11  ;;  %v1522_v11 = vpop.permute.xlu1 %1521 }
 0x270   : > { %v2926_v7 = vpop.f32.mrf.mxu2 }
 0x271   : > { %v2928_v19 = vpop.f32.mrf.mxu3 }
 0x272   : > { %v1246_v20 = vpop.f32.mrf.mxu0 }
 0x273   : > { %v1335_v62 = vpop.f32.mrf.mxu1 }
 0x274   : > { %v1336_v49 = vadd.f32 %v1335_v62, %v2842_v52  ;;  %v1664_v62 = vmul.f32 %v1507_v42, %v1408_v54 }
 0x276   : > { %v2968_v8 = vpop.permute.xlu1 %1536 }
 0x278   : > { %v2936_v27 = vpop.f32.mrf.mxu2 }
 0x279   : > { %v2938_v28 = vpop.f32.mrf.mxu3 }
 0x27a   : > { %v1249_v53 = vpop.f32.mrf.mxu0 }
 0x27b   : > { %v1338_v32 = vpop.f32.mrf.mxu1  ;;  %v1250_v9 = vadd.f32 %v1249_v53, %v2844_v25 }
 0x280   : > { %v2944_v36 = vpop.f32.mrf.mxu2 }
 0x281   : > { %3159 = vst [vmem:[#allocation20_spill] sm:$0xff] %v2944_v36  ;;  %v2946_v37 = vpop.f32.mrf.mxu3 }
 0x282   : > { %3160 = vst [vmem:[#allocation21_spill] sm:$0xff] %v2946_v37  ;;  %v1251_v38 = vpop.f32.mrf.mxu0  ;;  %v1416_v37 = vmax.f32 %v1250_v9, 0.0 }
 0x283   : > { %v1340_v39 = vpop.f32.mrf.mxu1 }
 0x284   : > { %v1672_v9 = vmul.f32 %v1527_v18, %v1416_v37 }
 0x288   : > { %v2950_v43 = vpop.f32.mrf.mxu2 }
 0x289   : > { %3162 = vst [vmem:[#allocation23_spill] sm:$0xff] %v2950_v43  ;;  %v2952_v44 = vpop.f32.mrf.mxu3 }
 0x28a   : > { %3163 = vst [vmem:[#allocation24_spill] sm:$0xff] %v2952_v44  ;;  %v1254_v13 = vpop.f32.mrf.mxu0  ;;  %v1412_v44 = vmax.f32 %v1245_v22, 0.0  ;;  %v1341_v22 = vadd.f32 %v1340_v39, %v2854_v56 }
 0x28b   : > { %v1343_v14 = vpop.f32.mrf.mxu1 }
 0x28c   : > { %v1668_v53 = vmul.f32 %v1517_v61, %v1412_v44  ;;  %v1419_v39 = vmax.f32 %v1341_v22, 0.0 }
 0x290   : > { %v2954_v3 = vpop.f32.mrf.mxu2 }
 0x291   : > { %3164 = vst [vmem:[#allocation25_spill] sm:$0xff] %v2954_v3  ;;  %v2956_v33 = vpop.f32.mrf.mxu3  ;;  %v1334_v3 = vadd.f32 %v1333_v15, %v2840_v51  ;;  %v1666_v51 = vmul.f32 %v1512_v45, %v1410_v5  ;;  %v1344_v5 = vadd.f32 %v1343_v14, %v2858_v55 }
 0x292   : > { %3165 = vst [vmem:[#allocation26_spill] sm:$0xff] %v2956_v33  ;;  %v1256_v35 = vpop.f32.mrf.mxu0  ;;  %v1329_v33 = vadd.f32 %v1328_v57, %v2832_v48  ;;  %v1339_v48 = vadd.f32 %v1338_v32, %v2844_v25 }
 0x293   : > { %v1345_v34 = vpop.f32.mrf.mxu1  ;;  %v1413_v24 = vmax.f32 %v1334_v3, 0.0  ;;  %v1255_v3 = vadd.f32 %v1254_v13, %v2858_v55  ;;  %v1421_v55 = vmax.f32 %v1344_v5, 0.0 }
 0x294   : > { %v1409_v43 = vmax.f32 %v1329_v33, 0.0  ;;  %v1346_v44 = vadd.f32 %v1345_v34, %v2860_v59  ;;  %v2998_v34 = vpop.permute.xlu0 %1561 }
 0x295   : > { %v1669_v32 = vmul.f32 %v1517_v61, %v1413_v24  ;;  %v1420_v13 = vmax.f32 %v1255_v3, 0.0  ;;  %v1557_v24 = vpop.permute.xlu2 %1556 }
 0x296   : > { %v1665_v25 = vmul.f32 %v1507_v42, %v1409_v43 }
 0x298   : > { %v2960_v63 = vpop.f32.mrf.mxu2 }
 0x299   : > { %3166 = vst [vmem:[#allocation27_spill] sm:$0xff] %v2960_v63  ;;  %v2963_v16 = vpop.f32.mrf.mxu3  ;;  %v1247_v63 = vadd.f32 %v1246_v20, %v2842_v52  ;;  %v1252_v20 = vadd.f32 %v1251_v38, %v2854_v56  ;;  %v1415_v52 = vmax.f32 %v1336_v49, 0.0 }
 0x29a   : > { %3167 = vst [vmem:[#allocation28_spill] sm:$0xff] %v2963_v16  ;;  %v1259_v12 = vpop.f32.mrf.mxu0  ;;  %v1411_v16 = vmax.f32 %v1331_v50, 0.0 }
 0x29b   : > { %v1348_v58 = vpop.f32.mrf.mxu1  ;;  %v1414_v15 = vmax.f32 %v1247_v63, 0.0  ;;  %v1728_v63 = vadd.f32 %v1666_v51, %v1664_v62  ;;  %v1418_v36 = vmax.f32 %v1252_v20, 0.0  ;;  %v1671_v56 = vmul.f32 %v1522_v11, %v1415_v52 }
 0x29c   : > { %v1667_v50 = vmul.f32 %v1512_v45, %v1411_v16  ;;  %v1257_v16 = vadd.f32 %v1256_v35, %v2860_v59  ;;  %v1552_v45 = vpop.permute.xlu1 %1551  ;;  %v1260_v42 = vadd.f32 %v1259_v12, %v2862_v60  ;;  %v1349_v14 = vadd.f32 %v1348_v58, %v2862_v60 }
 0x29d   : > { %v1670_v38 = vmul.f32 %v1522_v11, %v1414_v15  ;;  %v1729_v54 = vadd.f32 %v1728_v63, %v1668_v53  ;;  %v1674_v51 = vmul.f32 %v2958_v17, %v1418_v36  ;;  %v1675_v12 = vmul.f32 %v2958_v17, %v1419_v39 }
 0x29e   : > { %v1765_v49 = vadd.f32 %v1667_v50, %v1665_v25  ;;  %v1422_v11 = vmax.f32 %v1257_v16, 0.0  ;;  %v1423_v20 = vmax.f32 %v1346_v44, 0.0  ;;  %v1676_v58 = vmul.f32 %v2968_v8, %v1420_v13 }
 0x29f   : > { %v1730_v35 = vadd.f32 %v1729_v54, %v1670_v38  ;;  %v1424_v50 = vmax.f32 %v1260_v42, 0.0  ;;  %v1425_v62 = vmax.f32 %v1349_v14, 0.0  ;;  %v1359_v13 = vadd.f32 %v2905_v29, %v2875_v21 }
 0x2a0   : > { %v2980_v57 = vpop.f32.mrf.mxu2  ;;  %v1766_v43 = vadd.f32 %v1765_v49, %v1669_v32  ;;  %v1678_v17 = vmul.f32 %v2973_v30, %v1422_v11  ;;  %v1361_v11 = vadd.f32 %v2913_v31, %v2877_v23  ;;  %v1275_v29 = vadd.f32 %v2926_v7, %v2882_v4 }
 0x2a1   : > { %3168 = vst [vmem:[#allocation29_spill] sm:$0xff] %v2980_v57  ;;  %v2983_v26 = vpop.f32.mrf.mxu3  ;;  %v1417_v57 = vmax.f32 %v1339_v48, 0.0  ;;  %v1731_v60 = vadd.f32 %v1730_v35, %v1672_v9  ;;  %v1680_v63 = vmul.f32 %v2977_v6, %v1424_v50  ;;  %v1366_v50 = vadd.f32 %v2938_v28, %v2885_v0 }
 0x2a2   : > { %v1261_v46 = vpop.f32.mrf.mxu0  ;;  %v1767_v37 = vadd.f32 %v1766_v43, %v1671_v56  ;;  %v1681_v56 = vmul.f32 %v2977_v6, %v1425_v62  ;;  %v1272_v6 = vadd.f32 %v2911_v47, %v2877_v23  ;;  %v1433_v47 = vmax.f32 %v1359_v13, 0.0  ;;  %v3174_v13 = vld [vmem:[#allocation7_spill] sm:$0xff] }
 0x2a3   : > { %v1350_v33 = vpop.f32.mrf.mxu1  ;;  %v1673_v61 = vmul.f32 %v1527_v18, %v1417_v57  ;;  %v1262_v15 = vadd.f32 %v1261_v46, %v2867_v2  ;;  %v1677_v46 = vmul.f32 %v2968_v8, %v1421_v55  ;;  %v1732_v3 = vadd.f32 %v1731_v60, %v1674_v51 }
 0x2a4   : > { %v1351_v18 = vadd.f32 %v1350_v33, %v2867_v2  ;;  %v1679_v2 = vmul.f32 %v2973_v30, %v1423_v20  ;;  %v1567_v16 = vpop.permute.xlu1 %1566  ;;  %v1572_v30 = vpop.permute.xlu2 %1571  ;;  %v1277_v23 = vadd.f32 %v2936_v27, %v2885_v0 }
 0x2a5   : > { %v1768_v22 = vadd.f32 %v1767_v37, %v1673_v61  ;;  %v1426_v25 = vmax.f32 %v1262_v15, 0.0  ;;  %v1733_v5 = vadd.f32 %v1732_v3, %v1676_v58  ;;  %v1434_v58 = vmax.f32 %v1272_v6, 0.0 }
 0x2a6   : > { %v1427_v33 = vmax.f32 %v1351_v18, 0.0  ;;  %v1364_v18 = vadd.f32 %v2928_v19, %v2882_v4  ;;  %v1436_v4 = vmax.f32 %v1275_v29, 0.0  ;;  %v3169_v19 = vld [vmem:[#allocation20_spill] sm:$0xff]  ;;  %v1689_v3 = vmul.f32 %v1567_v16, %v1433_v47 }
 0x2a7   : > { %v1769_v32 = vadd.f32 %v1768_v22, %v1675_v12  ;;  %v1734_v44 = vadd.f32 %v1733_v5, %v1678_v17  ;;  %v1682_v54 = vmul.f32 %v1552_v45, %v1426_v25  ;;  %v3170_v25 = vld [vmem:[#allocation21_spill] sm:$0xff]  ;;  %v1690_v28 = vmul.f32 %v1572_v30, %v1434_v58 }
 0x2a8   : > { %v2992_v48 = vpop.f32.mrf.mxu2  ;;  %v1683_v43 = vmul.f32 %v1552_v45, %v1427_v33  ;;  %v1437_v17 = vmax.f32 %v1364_v18, 0.0  ;;  %v3172_v33 = vld [vmem:[#allocation23_spill] sm:$0xff]  ;;  %v3180_v58 = vld [vmem:[#allocation9_spill] sm:$0xff] }
 0x2a9   : > { %v2996_v59 = vpop.f32.mrf.mxu3  ;;  %v1770_v49 = vadd.f32 %v1769_v32, %v1677_v46  ;;  %v1735_v55 = vadd.f32 %v1734_v44, %v1680_v63  ;;  %v1280_v46 = vadd.f32 %v3169_v19, %v2888_v1  ;;  %v1369_v32 = vadd.f32 %v3170_v25, %v2888_v1 }
 0x2aa   : > { %v1264_v57 = vpop.f32.mrf.mxu0 }
 0x2ab   : > { %v1265_v36 = vadd.f32 %v1264_v57, %v2869_v40  ;;  %v1353_v52 = vpop.f32.mrf.mxu1  ;;  %v1771_v42 = vadd.f32 %v1770_v49, %v1679_v2  ;;  %v1736_v45 = vadd.f32 %v1735_v55, %v1682_v54  ;;  %v1438_v2 = vmax.f32 %v1277_v23, 0.0  ;;  %v3181_v23 = vld [vmem:[#allocation29_spill] sm:$0xff] }
 0x2ac   : > { %v1354_v53 = vadd.f32 %v1353_v52, %v2869_v40  ;;  %v1270_v40 = vadd.f32 %v2903_v10, %v2875_v21  ;;  %v1577_v10 = vpop.permute.xlu0 %1576  ;;  %v1582_v27 = vpop.permute.xlu1 %1581  ;;  %v1441_v55 = vmax.f32 %v1369_v32, 0.0 }
 0x2ad   : > { %v1428_v38 = vmax.f32 %v1265_v36, 0.0  ;;  %v1772_v15 = vadd.f32 %v1771_v42, %v1681_v56  ;;  %v1439_v56 = vmax.f32 %v1366_v50, 0.0  ;;  %v1692_v54 = vmul.f32 %v1577_v10, %v1436_v4  ;;  %v3175_v42 = vld [vmem:[#allocation25_spill] sm:$0xff] }
 0x2ae   : > { %v1429_v8 = vmax.f32 %v1354_v53, 0.0  ;;  %v1432_v21 = vmax.f32 %v1270_v40, 0.0  ;;  %v1693_v6 = vmul.f32 %v1577_v10, %v1437_v17 }
 0x2af   : > { %v1684_v14 = vmul.f32 %v1557_v24, %v1428_v38  ;;  %v1773_v57 = vadd.f32 %v1772_v15, %v1683_v43  ;;  %v1587_v38 = vpop.permute.xlu2 %1586  ;;  %v1285_v43 = vadd.f32 %v3175_v42, %v3174_v13  ;;  %v3177_v15 = vld [vmem:[#allocation8_spill] sm:$0xff]  ;;  %v1695_v29 = vmul.f32 %v1582_v27, %v1439_v56 }
 0x2b0   : > { %v3010_v39 = vpop.f32.mrf.mxu2  ;;  %v1685_v37 = vmul.f32 %v1557_v24, %v1429_v8  ;;  %v1688_v22 = vmul.f32 %v1567_v16, %v1432_v21  ;;  %v3173_v8 = vld [vmem:[#allocation24_spill] sm:$0xff]  ;;  %v1440_v16 = vmax.f32 %v1280_v46, 0.0  ;;  %v1697_v50 = vmul.f32 %v1587_v38, %v1441_v55 }
 0x2b1   : > { %v3014_v9 = vpop.f32.mrf.mxu3  ;;  %v1737_v31 = vadd.f32 %v1736_v45, %v1684_v14  ;;  %v3176_v14 = vld [vmem:[#allocation26_spill] sm:$0xff]  ;;  %v1444_v10 = vmax.f32 %v1285_v43, 0.0 }
 0x2b2   : > { %v1266_v61 = vpop.f32.mrf.mxu0  ;;  %v1774_v7 = vadd.f32 %v1773_v57, %v1685_v37  ;;  %v3178_v37 = vld [vmem:[#allocation27_spill] sm:$0xff] }
 0x2b3   : > { %v1267_v35 = vadd.f32 %v1266_v61, %v2873_v41  ;;  %v1355_v51 = vpop.f32.mrf.mxu1 }
 0x2b4   : > { %v1356_v12 = vadd.f32 %v1355_v51, %v2873_v41  ;;  %v1435_v41 = vmax.f32 %v1361_v11, 0.0  ;;  %v1592_v61 = vpop.permute.xlu0 %1591  ;;  %v1694_v11 = vmul.f32 %v1582_v27, %v1438_v2 }
 0x2b5   : > { %v1430_v20 = vmax.f32 %v1267_v35, 0.0  ;;  %v1374_v35 = vadd.f32 %v3176_v14, %v3174_v13 }
 0x2b6   : > { %v1431_v60 = vmax.f32 %v1356_v12, 0.0  ;;  %v1691_v49 = vmul.f32 %v1572_v30, %v1435_v41  ;;  %v1287_v12 = vadd.f32 %v3178_v37, %v3177_v15 }
 0x2b7   : > { %v1686_v24 = vmul.f32 %v2998_v34, %v1430_v20  ;;  %v3179_v20 = vld [vmem:[#allocation28_spill] sm:$0xff] }
 0x2b8   : > { %v1687_v36 = vmul.f32 %v2998_v34, %v1431_v60  ;;  %v3034_v52 = vpop.f32.mrf.mxu2  ;;  %v3171_v34 = vld [vmem:[#allocation6_spill] sm:$0xff]  ;;  %v1376_v47 = vadd.f32 %v3179_v20, %v3177_v15  ;;  %v1696_v60 = vmul.f32 %v1587_v38, %v1440_v16  ;;  %v1446_v19 = vmax.f32 %v1287_v12, 0.0  ;;  %v3184_v20 = vld [vmem:[#allocation12_spill] sm:$0xff] }
 0x2b9   : > { %v1738_v62 = vadd.f32 %v1737_v31, %v1686_v24  ;;  %v3038_v53 = vpop.f32.mrf.mxu3  ;;  %v1282_v5 = vadd.f32 %v3172_v33, %v3171_v34  ;;  %v1371_v40 = vadd.f32 %v3173_v8, %v3171_v34  ;;  %v1290_v31 = vadd.f32 %v3181_v23, %v3180_v58 }
 0x2ba   : > { %v1775_v0 = vadd.f32 %v1774_v7, %v1687_v36  ;;  %v1445_v7 = vmax.f32 %v1374_v35, 0.0  ;;  %v1379_v36 = vadd.f32 %v2983_v26, %v3180_v58 }
 0x2bb   : > { %v1739_v63 = vadd.f32 %v1738_v62, %v1688_v22  ;;  %v1442_v30 = vmax.f32 %v1282_v5, 0.0  ;;  %v1443_v45 = vmax.f32 %v1371_v40, 0.0  ;;  %v1597_v62 = vpop.permute.xlu1 %1596  ;;  %v1448_v32 = vmax.f32 %v1290_v31, 0.0 }
 0x2bc   : > { %v1776_v44 = vadd.f32 %v1775_v0, %v1689_v3  ;;  %v1447_v3 = vmax.f32 %v1376_v47, 0.0  ;;  %v1700_v25 = vmul.f32 %v1597_v62, %v1444_v10  ;;  %v1701_v2 = vmul.f32 %v1597_v62, %v1445_v7  ;;  %v1607_v38 = vpop.permute.xlu0 %1606 }
 0x2bd   : > { %v1740_v1 = vadd.f32 %v1739_v63, %v1690_v28  ;;  %v1698_v4 = vmul.f32 %v1592_v61, %v1442_v30  ;;  %v1699_v27 = vmul.f32 %v1592_v61, %v1443_v45  ;;  %v1602_v28 = vpop.permute.xlu2 %1601  ;;  %v1449_v34 = vmax.f32 %v1379_v36, 0.0  ;;  %v3182_v61 = vld [vmem:[#allocation10_spill] sm:$0xff]  ;;  %v3183_v30 = vld [vmem:[#allocation11_spill] sm:$0xff] }
 0x2be   : > { %v1777_v51 = vadd.f32 %v1776_v44, %v1691_v49  ;;  %v1702_v5 = vmul.f32 %v1602_v28, %v1446_v19  ;;  %v1703_v49 = vmul.f32 %v1602_v28, %v1447_v3  ;;  %v1704_v8 = vmul.f32 %v1607_v38, %v1448_v32 }
 0x2bf   : > { %v1741_v21 = vadd.f32 %v1740_v1, %v1692_v54  ;;  %v1705_v54 = vmul.f32 %v1607_v38, %v1449_v34  ;;  %v1381_v55 = vadd.f32 %v2996_v59, %v3182_v61  ;;  %v1295_v15 = vadd.f32 %v3010_v39, %v3183_v30  ;;  %v3188_v38 = vld [vmem:[#allocation16_spill] sm:$0xff] }
 0x2c0   : > { %v1778_v18 = vadd.f32 %v1777_v51, %v1693_v6  ;;  %v1299_v57 = vpop.f32.mrf.mxu2  ;;  %v1292_v6 = vadd.f32 %v2992_v48, %v3182_v61  ;;  %v1384_v12 = vadd.f32 %v3014_v9, %v3183_v30  ;;  %v1297_v48 = vadd.f32 %v3034_v52, %v3184_v20 }
 0x2c1   : > { %v1742_v24 = vadd.f32 %v1741_v21, %v1694_v11  ;;  %v1388_v41 = vpop.f32.mrf.mxu3  ;;  %v1451_v37 = vmax.f32 %v1381_v55, 0.0  ;;  %v1452_v45 = vmax.f32 %v1295_v15, 0.0  ;;  %v1386_v59 = vadd.f32 %v3038_v53, %v3184_v20 }
 0x2c2   : > { %v1779_v22 = vadd.f32 %v1778_v18, %v1695_v29  ;;  %v1450_v11 = vmax.f32 %v1292_v6, 0.0  ;;  %v1453_v18 = vmax.f32 %v1384_v12, 0.0 }
 0x2c3   : > { %v1743_v46 = vadd.f32 %v1742_v24, %v1696_v60  ;;  %v1612_v51 = vpop.permute.xlu1 %1611  ;;  %v1454_v24 = vmax.f32 %v1297_v48, 0.0 }
 0x2c4   : > { %v1780_v17 = vadd.f32 %v1779_v22, %v1697_v50  ;;  %v1706_v29 = vmul.f32 %v1612_v51, %v1450_v11  ;;  %v1707_v47 = vmul.f32 %v1612_v51, %v1451_v37  ;;  %v1622_v23 = vpop.permute.xlu0 %1621  ;;  %v3185_v50 = vld [vmem:[#allocation13_spill] sm:$0xff]  ;;  %v1455_v22 = vmax.f32 %v1386_v59, 0.0  ;;  %v3190_v51 = vld [vmem:[#allocation18_spill] sm:$0xff] }
 0x2c5   : > { %v1744_v0 = vadd.f32 %v1743_v46, %v1698_v4  ;;  %v1617_v21 = vpop.permute.xlu2 %1616  ;;  %v1300_v9 = vadd.f32 %v1299_v57, %v3185_v50  ;;  %v1389_v4 = vadd.f32 %v1388_v41, %v3185_v50  ;;  %v1710_v46 = vmul.f32 %v1622_v23, %v1454_v24 }
 0x2c6   : > { %v1781_v33 = vadd.f32 %v1780_v17, %v1699_v27  ;;  %v1708_v31 = vmul.f32 %v1617_v21, %v1452_v45  ;;  %v1709_v36 = vmul.f32 %v1617_v21, %v1453_v18  ;;  %v3186_v27 = vld [vmem:[#allocation14_spill] sm:$0xff]  ;;  %v1711_v17 = vmul.f32 %v1622_v23, %v1455_v22 }
 0x2c7   : > { %v1745_v63 = vadd.f32 %v1744_v0, %v1700_v25  ;;  %v1456_v62 = vmax.f32 %v1300_v9, 0.0  ;;  %v1457_v25 = vmax.f32 %v1389_v4, 0.0 }
 0x2c8   : > { %v1782_v26 = vadd.f32 %v1781_v33, %v1701_v2  ;;  %v1301_v56 = vpop.f32.mrf.mxu2  ;;  %v3187_v2 = vld [vmem:[#allocation15_spill] sm:$0xff] }
 0x2c9   : > { %v1746_v40 = vadd.f32 %v1745_v63, %v1702_v5  ;;  %v1390_v44 = vpop.f32.mrf.mxu3  ;;  %v1302_v53 = vadd.f32 %v1301_v56, %v3186_v27 }
 0x2ca   : > { %v1783_v16 = vadd.f32 %v1782_v26, %v1703_v49  ;;  %v1391_v32 = vadd.f32 %v1390_v44, %v3186_v27  ;;  %v3189_v44 = vld [vmem:[#allocation17_spill] sm:$0xff] }
 0x2cb   : > { %v1747_v13 = vadd.f32 %v1746_v40, %v1704_v8  ;;  %v1627_v7 = vpop.permute.xlu1 %1626  ;;  %v1458_v63 = vmax.f32 %v1302_v53, 0.0 }
 0x2cc   : > { %v1784_v42 = vadd.f32 %v1783_v16, %v1705_v54  ;;  %v1712_v41 = vmul.f32 %v1627_v7, %v1456_v62  ;;  %v1637_v26 = vpop.permute.xlu0 %1636  ;;  %v1713_v8 = vmul.f32 %v1627_v7, %v1457_v25  ;;  %v1459_v56 = vmax.f32 %v1391_v32, 0.0 }
 0x2cd   : > { %v1748_v10 = vadd.f32 %v1747_v13, %v1706_v29  ;;  %v1632_v3 = vpop.permute.xlu2 %1631  ;;  %v3191_v29 = vld [vmem:[#allocation19_spill] sm:$0xff] }
 0x2ce   : > { %v1785_v39 = vadd.f32 %v1784_v42, %v1707_v47  ;;  %v1714_v55 = vmul.f32 %v1632_v3, %v1458_v63  ;;  %v1715_v30 = vmul.f32 %v1632_v3, %v1459_v56 }
 0x2cf   : > { %v1749_v52 = vadd.f32 %v1748_v10, %v1708_v31 }
 0x2d0   : > { %v1304_v43 = vpop.f32.mrf.mxu2  ;;  %v1786_v19 = vadd.f32 %v1785_v39, %v1709_v36 }
 0x2d1   : > { %v1393_v1 = vpop.f32.mrf.mxu3  ;;  %v1750_v28 = vadd.f32 %v1749_v52, %v1710_v46  ;;  %v1305_v57 = vadd.f32 %v1304_v43, %v3187_v2 }
 0x2d2   : > { %v1787_v33 = vadd.f32 %v1786_v19, %v1711_v17  ;;  %v1394_v5 = vadd.f32 %v1393_v1, %v3187_v2  ;;  %v3192_v17 = vld [vmem:[#allocation22_spill] sm:$0xff] }
 0x2d3   : > { %v1751_v54 = vadd.f32 %v1750_v28, %v1712_v41  ;;  %v1460_v16 = vmax.f32 %v1305_v57, 0.0  ;;  %v1642_v42 = vpop.permute.xlu1 %1641 }
 0x2d4   : > { %v1788_v61 = vadd.f32 %v1787_v33, %v1713_v8  ;;  %v1461_v43 = vmax.f32 %v1394_v5, 0.0  ;;  %v1652_v9 = vpop.permute.xlu0 %1651 }
 0x2d5   : > { %v1752_v12 = vadd.f32 %v1751_v54, %v1714_v55  ;;  %v1647_v48 = vpop.permute.xlu2 %1646 }
 0x2d6   : > { %v1789_v47 = vadd.f32 %v1788_v61, %v1715_v30  ;;  %v1717_v18 = vmul.f32 %v1637_v26, %v1461_v43 }
 0x2d8   : > { %v1306_v14 = vpop.f32.mrf.mxu2  ;;  %v1790_v7 = vadd.f32 %v1789_v47, %v1717_v18 }
 0x2d9   : > { %v1395_v35 = vpop.f32.mrf.mxu3  ;;  %v1307_v49 = vadd.f32 %v1306_v14, %v3188_v38 }
 0x2da   : > { %v1396_v40 = vadd.f32 %v1395_v35, %v3188_v38  ;;  %v1716_v35 = vmul.f32 %v1637_v26, %v1460_v16 }
 0x2db   : > { %v1462_v1 = vmax.f32 %v1307_v49, 0.0  ;;  %v1657_v19 = vpop.permute.xlu1 %1656 }
 0x2dc   : > { %v1463_v14 = vmax.f32 %v1396_v40, 0.0  ;;  %v1753_v31 = vadd.f32 %v1752_v12, %v1716_v35 }
 0x2dd   : > { %v1718_v10 = vmul.f32 %v1642_v42, %v1462_v1  ;;  %v1662_v33 = vpop.permute.xlu2 %1661 }
 0x2de   : > { %v1719_v23 = vmul.f32 %v1642_v42, %v1463_v14  ;;  %v1817_v14 = vlaneseq }
 0x2df   : > { %v1754_v4 = vadd.f32 %v1753_v31, %v1718_v10 }
 0x2e0   : > { %v1309_v60 = vpop.f32.mrf.mxu2  ;;  %v1791_v46 = vadd.f32 %v1790_v7, %v1719_v23  ;;  %vm1819_vm2 = vcmp.lt.s32.totalorder %v1817_v14, 256 }
 0x2e1   : > { %v1398_v58 = vpop.f32.mrf.mxu3  ;;  %v1310_v13 = vadd.f32 %v1309_v60, %v3189_v44 }
 0x2e2   : > { %v1399_v6 = vadd.f32 %v1398_v58, %v3189_v44 }
 0x2e3   : > { %v1464_v21 = vmax.f32 %v1310_v13, 0.0 }
 0x2e4   : > { %v1465_v59 = vmax.f32 %v1399_v6, 0.0  ;;  %v1806_v6 = vpop.permute.xlu0 %1805 }
 0x2e5   : > { %v1720_v24 = vmul.f32 %v1647_v48, %v1464_v21 }
 0x2e6   : > { %v1721_v36 = vmul.f32 %v1647_v48, %v1465_v59 }
 0x2e7   : > { %v1755_v53 = vadd.f32 %v1754_v4, %v1720_v24 }
 0x2e8   : > { %v1311_v0 = vpop.f32.mrf.mxu2 }
 0x2e9   : > { %v1400_v34 = vpop.f32.mrf.mxu3  ;;  %v1312_v11 = vadd.f32 %v1311_v0, %v3190_v51  ;;  %v1792_v0 = vadd.f32 %v1791_v46, %v1721_v36 }
 0x2ea   : > { %v1401_v15 = vadd.f32 %v1400_v34, %v3190_v51  ;;  %v1808_v51 = vperm.slane %v1806_v6, 0 }
 0x2eb   : > { %v1466_v58 = vmax.f32 %v1312_v11, 0.0 }
 0x2ec   : > { %v1467_v39 = vmax.f32 %v1401_v15, 0.0 }
 0x2ed   : > { %v1722_v52 = vmul.f32 %v1652_v9, %v1466_v58 }
 0x2ee   : > { %v1723_v62 = vmul.f32 %v1652_v9, %v1467_v39 }
 0x2ef   : > { %v1756_v57 = vadd.f32 %v1755_v53, %v1722_v52 }
 0x2f0   : > { %v1314_v37 = vpop.f32.mrf.mxu2  ;;  %v1793_v5 = vadd.f32 %v1792_v0, %v1723_v62 }
 0x2f1   : > { %v1315_v45 = vadd.f32 %v1314_v37, %v3191_v29  ;;  %v1403_v20 = vpop.f32.mrf.mxu3 }
 0x2f2   : > { %v1404_v60 = vadd.f32 %v1403_v20, %v3191_v29 }
 0x2f3   : > { %v1468_v50 = vmax.f32 %v1315_v45, 0.0 }
 0x2f4   : > { %v1469_v22 = vmax.f32 %v1404_v60, 0.0 }
 0x2f5   : > { %v1724_v3 = vmul.f32 %v1657_v19, %v1468_v50 }
 0x2f6   : > { %v1725_v28 = vmul.f32 %v1657_v19, %v1469_v22 }
 0x2f7   : > { %v1757_v63 = vadd.f32 %v1756_v57, %v1724_v3 }
 0x2f8   : > { %v1316_v27 = vpop.f32.mrf.mxu2  ;;  %v1794_v49 = vadd.f32 %v1793_v5, %v1725_v28 }
 0x2f9   : > { %v1317_v25 = vadd.f32 %v1316_v27, %v3192_v17  ;;  %v1405_v32 = vpop.f32.mrf.mxu3 }
 0x2fa   : > { %v1406_v2 = vadd.f32 %v1405_v32, %v3192_v17 }
 0x2fb   : > { %v1470_v34 = vmax.f32 %v1317_v25, 0.0 }
 0x2fc   : > { %v1471_v41 = vmax.f32 %v1406_v2, 0.0 }
 0x2fd   : > { %v1726_v38 = vmul.f32 %v1662_v33, %v1470_v34 }
 0x2fe   : > { %v1727_v26 = vmul.f32 %v1662_v33, %v1471_v41 }
 0x2ff   : > { %v1758_v8 = vadd.f32 %v1757_v63, %v1726_v38 }
 0x300   : > { %v1795_v56 = vadd.f32 %v1794_v49, %v1727_v26 }
 0x301   : > { %v1759_v40 = vrot.slane %v1758_v8, 4 }
 0x302   : > { %v1796_v54 = vrot.slane %v1795_v56, 4 }
 0x303   : > { %v1760_v16 = vadd.f32 %v1759_v40, %v1758_v8 }
 0x304   : > { %v1797_v44 = vadd.f32 %v1796_v54, %v1795_v56 }
 0x305   : > { %v1761_v13 = vrot.slane %v1760_v16, 2 }
 0x306   : > { %v1798_v42 = vrot.slane %v1797_v44, 2 }
 0x307   : > { %v1762_v61 = vadd.f32 %v1761_v13, %v1760_v16 }
 0x308   : > { %v1799_v43 = vadd.f32 %v1798_v42, %v1797_v44 }
 0x309   : > { %v1763_v55 = vrot.slane %v1762_v61, 1 }
 0x30a   : > { %v1800_v1 = vrot.slane %v1799_v43, 1 }
 0x30b   : > { %v1764_v11 = vadd.f32 %v1763_v55, %v1762_v61 }
 0x30c   : > { %v1801_v30 = vadd.f32 %v1800_v1, %v1799_v43 }
 0x30d   : > { %v1809_v37 = vadd.f32 %v1808_v51, %v1764_v11 }
 0x30e   : > { %v1810_v15 = vadd.f32 %v1808_v51, %v1801_v30 }
 0x310   : > { %v1813_v12 = vrot.slane %v1810_v15, 7 }
 0x312   : > { %v1815_v35 = vsel %vm1814_vm1, %v1809_v37, %v1813_v12 }
 0x313   : > { %1821 = vst.msk [vmem:[%s328_s27] sm:$0x3] %vm1819_vm2, %v1815_v35 }
 0x314   : > { %2153 = shalt.err (!%p2150_p3)
}
 0x315   : > { %2056 = dma.vmem_to_hbm [thread:$0]  (%p2284_p5), %s1836_s29, 32, %s1838_s30, %s1823_s10  }
 0x316 PF: > { %p2062_p4 = scmp.ge.s32.totalorder %s2188_s14, 2  ;;  %s1849_s22 = sand.u32 1, %s2176_s11  }
 0x317   : > { %s1850_s25 = scalar_lea.sflag [#allocation4], %s1849_s22 }
 0x318   : > { %p2059_p7 = pnand %p2062_p4, %p2288_p6 }
 0x31a   : > { %p2060_p8 = pneg %p2059_p7 }
 0x31c   : > { %2171 = dma.done.wait (%p2060_p8), %s1850_s25, 32  }
 0x31d   : > { %2173 = vsyncadd (%p2060_p8), %s1850_s25, 4294967264  ;;  %p21_p9 = scmp.ge.s32.totalorder %s2270_s16, 4   ;;  %s3193_s11 = smov %s2180_s12 }
 0x31e   : > { %s3194_s12 = smov %s2184_s13  ;;  %s3195_s13 = smov %s2282_s19 }
 0x31f   : > { %s3196_s14 = smov %s2270_s16  ;;  %23 = sbr.rel (!%p21_p9) target bundleno = 6 (0x6), region = 91 }
 0x324   :  { %1856 = vsyncpa [#allocation4], 1 }
 0x325   :  { %1858 = vsyncpa [#allocation4 + $0x1], 1 }

</bundles_post_ra>
